<compile_context>
chip_gen: v6e
topology: v6e:2x2x1
jax: 0.10.0
libtpu: 0.0.40
codegen_flags: <defaults>
</compile_context>

<pallas_src>
import functools

import numpy as np
import jax
import jax.numpy as jnp
from jax.experimental import pallas as pl
from jax.experimental.pallas import tpu as pltpu


# ----------------------------------------------------------------------------
# Pallas kernel
# ----------------------------------------------------------------------------
def _expand_kernel(x_ref, o_ref, *, s):
    """x_ref: (s, s, tH, W);  o_ref: (tH, s*W*s).

    o[hh, s1*W*s + w*s + s2] = x[s1, s2, hh, w]
    (row hh of the output block packs the s consecutive output rows hh*s + s1,
    each of width W*s, s1-major — so the wrapper's final reshape is a pure view).
    """
    tH = x_ref.shape[2]
    W = x_ref.shape[3]

    # 1) For each s2, lay the s1 planes side by side along lanes:
    #    planes[s2][hh, s1*W + w] = x[s1, s2, hh, w]            -> (tH, s*W)
    planes = [
        jnp.concatenate([x_ref[s1, s2, :, :] for s1 in range(s)], axis=-1)
        for s2 in range(s)
    ]

    # 2) Interleave the s2 variants element-wise along lanes:
    #    (tH, s*W, s) -> (tH, s*W*s); column (s1*W + w)*s + s2 = s1*W*s + w*s + s2.
    out = jnp.stack(planes, axis=-1).reshape(tH, s * W * s)
    o_ref[...] = out.astype(o_ref.dtype)


# ----------------------------------------------------------------------------
# Wrapper
# ----------------------------------------------------------------------------
def _pick_row_tile(H, s, W, itemsize, target_bytes=1 << 20):
    """Largest row tile that divides H, is a multiple of 8 (or all of H), and keeps a
    block at ~<=1 MiB so BlockSpec double-buffering pipelines cleanly (v7x VMEM-safe)."""
    cands = sorted({t for t in range(8, H + 1, 8) if H % t == 0} | {H})
    row_bytes = s * s * W * itemsize
    fitting = [t for t in cands if t * row_bytes <= target_bytes]
    return max(fitting) if fitting else min(cands)


def expand_pallas(x, gain=2):
    """x: (B, C, H, W) NCHW -> (B, C // gain**2, H * gain, W * gain)."""
    B, C, H, W = x.shape
    s = int(gain)
    assert C % (s * s) == 0, (C, s)
    C2 = C // (s * s)

    xv = x.reshape(B, s, s, C2, H, W)          # free view: split of the channel dim
    tH = _pick_row_tile(H, s, W, x.dtype.itemsize)
    grid = (B, C2, H // tH)

    out4 = pl.pallas_call(
        functools.partial(_expand_kernel, s=s),
        out_shape=jax.ShapeDtypeStruct((B, C2, H, s * W * s), x.dtype),
        grid=grid,
        in_specs=[
            pl.BlockSpec((None, s, s, None, tH, W),
                         lambda b, c2, h: (b, 0, 0, c2, h, 0)),
        ],
        out_specs=pl.BlockSpec((None, None, tH, s * W * s),
                               lambda b, c2, h: (b, c2, h, 0)),
        compiler_params=pltpu.CompilerParams(
            dimension_semantics=("parallel", "parallel", "parallel")),
    )(xv)

    # Free view: (B, C2, H, s*W*s) == (B, C2, H, s, W, s) -> (B, C2, H*s, W*s).
    return out4.reshape(B, C2, H * s, W * s)


# ----------------------------------------------------------------------------
# Pure-JAX reference (mirrors the PyTorch forward) for the correctness check
# ----------------------------------------------------------------------------
def _expand_ref(x, gain):
    b, c, h, w = x.shape
    s = gain
    y = x.reshape(b, s, s, c // s**2, h, w)
    y = jnp.transpose(y, (0, 3, 4, 1, 5, 2))
    return y.reshape(b, c // s**2, h * s, w * s)


if __name__ == "__main__":
    key = jax.random.PRNGKey(0)
    B, C, H, W = 2, 4, 16, 16
    gain = 2

    x = jax.random.normal(key, (B, C, H, W), jnp.float32)      # NCHW, like PyTorch

    expand = jax.jit(functools.partial(expand_pallas, gain=gain))
    out = jax.block_until_ready(expand(x))
    assert out.shape == (B, C // gain**2, H * gain, W * gain), out.shape

    ref = jax.block_until_ready(_expand_ref(x, gain))
    np.testing.assert_array_equal(np.asarray(out), np.asarray(ref))   # exact: pure data movement

    print("KERNEL_OK")
</pallas_src>

<mosaic_0001>
module attributes {stable_mosaic.version = 11 : i64} {
  func.func @_expand_kernel(%arg0: i32, %arg1: i32, %arg2: i32, %arg3: memref<1x2x2x1x16x16xf32, #tpu.memory_space<vmem>>, %arg4: memref<1x1x16x64xf32, #tpu.memory_space<vmem>>) attributes {dimension_semantics = [#tpu.dimension_semantics<parallel>, #tpu.dimension_semantics<parallel>, #tpu.dimension_semantics<parallel>], iteration_bounds = array<i64: 2, 1, 1>, scalar_prefetch = 0 : i64, scratch_operands = 0 : i64, tpu.core_type = #tpu.core_type<tc>, window_params = [{transform_indices = @transform_0, window_bounds = array<i64: 1, 2, 2, 1, 16, 16>}, {transform_indices = @transform_1, window_bounds = array<i64: 1, 1, 16, 64>}]} {
    %c0 = arith.constant 0 : index
    %c0_0 = arith.constant 0 : index
    %c0_1 = arith.constant 0 : index
    %c0_2 = arith.constant 0 : index
    %c0_3 = arith.constant 0 : index
    %c0_4 = arith.constant 0 : index
    %0 = vector.load %arg3[%c0, %c0_0, %c0_1, %c0_2, %c0_3, %c0_4] : memref<1x2x2x1x16x16xf32, #tpu.memory_space<vmem>>, vector<1x1x1x1x16x16xf32>
    %1 = vector.shape_cast %0 : vector<1x1x1x1x16x16xf32> to vector<16x16xf32>
    %c0_5 = arith.constant 0 : index
    %c1 = arith.constant 1 : index
    %c0_6 = arith.constant 0 : index
    %c0_7 = arith.constant 0 : index
    %c0_8 = arith.constant 0 : index
    %c0_9 = arith.constant 0 : index
    %2 = vector.load %arg3[%c0_5, %c1, %c0_6, %c0_7, %c0_8, %c0_9] : memref<1x2x2x1x16x16xf32, #tpu.memory_space<vmem>>, vector<1x1x1x1x16x16xf32>
    %3 = vector.shape_cast %2 : vector<1x1x1x1x16x16xf32> to vector<16x16xf32>
    %4 = tpu.concatenate %1, %3 in 1 : vector<16x16xf32>, vector<16x16xf32> -> vector<16x32xf32>
    %c0_10 = arith.constant 0 : index
    %c0_11 = arith.constant 0 : index
    %c1_12 = arith.constant 1 : index
    %c0_13 = arith.constant 0 : index
    %c0_14 = arith.constant 0 : index
    %c0_15 = arith.constant 0 : index
    %5 = vector.load %arg3[%c0_10, %c0_11, %c1_12, %c0_13, %c0_14, %c0_15] : memref<1x2x2x1x16x16xf32, #tpu.memory_space<vmem>>, vector<1x1x1x1x16x16xf32>
    %6 = vector.shape_cast %5 : vector<1x1x1x1x16x16xf32> to vector<16x16xf32>
    %c0_16 = arith.constant 0 : index
    %c1_17 = arith.constant 1 : index
    %c1_18 = arith.constant 1 : index
    %c0_19 = arith.constant 0 : index
    %c0_20 = arith.constant 0 : index
    %c0_21 = arith.constant 0 : index
    %7 = vector.load %arg3[%c0_16, %c1_17, %c1_18, %c0_19, %c0_20, %c0_21] : memref<1x2x2x1x16x16xf32, #tpu.memory_space<vmem>>, vector<1x1x1x1x16x16xf32>
    %8 = vector.shape_cast %7 : vector<1x1x1x1x16x16xf32> to vector<16x16xf32>
    %9 = tpu.concatenate %6, %8 in 1 : vector<16x16xf32>, vector<16x16xf32> -> vector<16x32xf32>
    %10 = vector.shape_cast %4 : vector<16x32xf32> to vector<16x32x1xf32>
    %11 = vector.shape_cast %9 : vector<16x32xf32> to vector<16x32x1xf32>
    %12 = tpu.concatenate %10, %11 in 2 : vector<16x32x1xf32>, vector<16x32x1xf32> -> vector<16x32x2xf32>
    %13 = vector.shape_cast %12 : vector<16x32x2xf32> to vector<16x64xf32>
    %c0_22 = arith.constant 0 : index
    %c0_23 = arith.constant 0 : index
    %c0_24 = arith.constant 0 : index
    %c0_25 = arith.constant 0 : index
    %14 = vector.load %arg4[%c0_22, %c0_23, %c0_24, %c0_25] : memref<1x1x16x64xf32, #tpu.memory_space<vmem>>, vector<1x1x16x64xf32>
    %15 = vector.shape_cast %14 : vector<1x1x16x64xf32> to vector<16x64xf32>
    %16 = vector.shape_cast %13 : vector<16x64xf32> to vector<1x1x16x64xf32>
    tpu.vector_store %arg4[%c0_22, %c0_23, %c0_24, %c0_25], %16 {strides = array<i32>} : memref<1x1x16x64xf32, #tpu.memory_space<vmem>>, vector<1x1x16x64xf32>,
    return
  }
  func.func @transform_0(%arg0: i32, %arg1: i32, %arg2: i32) -> (i32, i32, i32, i32, i32, i32) {
    %c0_i32 = arith.constant 0 : i32
    %c0_i32_0 = arith.constant 0 : i32
    %c0_i32_1 = arith.constant 0 : i32
    %c0_i32_2 = arith.constant 0 : i32
    return %arg0, %c0_i32, %c0_i32_0, %arg1, %arg2, %c0_i32_1 : i32, i32, i32, i32, i32, i32
  }
  func.func @transform_1(%arg0: i32, %arg1: i32, %arg2: i32) -> (i32, i32, i32, i32) {
    %c0_i32 = arith.constant 0 : i32
    %c0_i32_0 = arith.constant 0 : i32
    return %arg0, %arg1, %arg2, %c0_i32 : i32, i32, i32, i32
  }
}

</mosaic_0001>

<bundles_post_ra>
// kernel: expand_pallas.1
= control target key start
LH: loop header
LB: loop body
LE: loop exit
PB: predicated region body
PF: predicated region fallthrough
CT: control target
= control target key end

     0   :  { %6 = vsyncpa [#allocation3], 0  ;;  %s3818_s0 = inlined_call_operand.hbm [shape: f32[2,2,2,1,16,16], index: 0, kind: input, shape index: {}]   ;;  %s3819_s1 = inlined_call_operand.vmem [shape: f32[2,1,16,64], index: 1, kind: output, shape index: {}]  }
   0x1   :  { %8 = vsyncpa [#allocation3 + $0x1], 0  ;;  %s2675_s6 = smov 0   ;;  %s2677_s7 = smov 0  }
   0x2   :  { %s2679_s8 = smov 0   ;;  %s2681_s9 = smov 0  }
   0x3   :  { %s2683_s10 = smov 0   ;;  %s2685_s11 = smov 0  }
   0x4 LB: > { %s2438_s12 = sadd.s32 4294967295, %s2627_s11   ;;  %s33_s13 = sadd.s32 1, %s2623_s10  ;;  %s2627_s11 = sphi %s2685_s11, %s14_s11   ;;  %s2623_s10 = sphi %s2683_s10, %s3934_s10   ;;  %s2619_s9 = sphi %s2681_s9, %s3933_s9   ;;  %s2615_s8 = sphi %s2679_s8, %s3932_s8   ;;  %s2611_s7 = sphi %s2677_s7, %s3931_s7   ;;  %s2607_s6 = sphi %s2675_s6, %s3930_s6  }
   0x5   : > { %p35_p0 = scmp.ge.s32.totalorder %s33_s13, 2  ;;  %s44_s14 = sadd.s32 1, %s2615_s8 }
   0x6   : > { %p51_p1 = scmp.ne.s32.totalorder %s2615_s8, %s2611_s7  ;;  %p52_p2 = scmp.eq.s32.totalorder %s2627_s11, 0 }
   0x7   : > { %s3936_s13 = smov (%p35_p0, %s33_s13), 0  ;;  %p57_p4 = scmp.ne.s32.totalorder %s2611_s7, %s2607_s6 }
   0x8   : > { %p2711_p3 = por %p52_p2, %p51_p1  ;;  %s37_s16 = ssub.s32 %s2623_s10, %s3936_s13 }
   0x9   : > { %p58_p5 = scmp.eq.s32.totalorder %s2438_s12, 0  ;;  %p42_p6 = scmp.eq.s32.totalorder %s37_s16, 0 }
   0xa   : > { %p2465_p8 = scmp.lt.s32.totalorder %s2627_s11, 2  ;;  %s111_s19 = sand.u32 1, %s2615_s8  }
   0xb   : > { %p2718_p7 = por %p58_p5, %p57_p4  ;;  %s2457_s20 = sshll.u32 %s2623_s10, 10 }
   0xc   : > { %s2724_s18 = scalar_select %p42_p6, %s2615_s8, %s44_s14  }
   0xd   : > { %s2442_s21 = sshll.u32 %s111_s19, 6  ;;  %s125_s24 = scalar_lea.hbm %s3818_s0, %s2457_s20 }
   0xe   : > { %s115_s25 = scalar_lea.vmem [#allocation2], %s2442_s21  ;;  %p2733_p9 = pnand %p2465_p8, %p2711_p3 }
   0xf   : > { %s126_s26 = sshll.u32 %s115_s25, 4  ;;  %s112_s28 = scalar_lea.sflag [#allocation3], %s111_s19  ;;  %s127_s26 = int_to_ptr.vmem [resolvable:$true] %s126_s26 }
  0x10   : > { %p2551_p10 = pneg %p2733_p9  ;;  %s2562_s29 = scalar_lea.vmem %s127_s26, 1024 }
  0x11   : > { %p2563_p11 = scmp.ne.s32.totalorder %s127_s26, %s2562_s29  ;;  %s2629_s30 = smov [#allocation2]  }
  0x12   : > { %s2567_s2 = sshll.u32 %s2629_s30, 4  ;;  %s2568_s2 = int_to_ptr.vmem [resolvable:$false] %s2567_s2 }
  0x13   : > { %p2565_p12 = pnand %p2563_p11, %p2551_p10  ;;  %s2569_s3 = scalar_lea.vmem %s2568_s2, 2048 }
  0x14   : > { %p2570_p0 = scmp.lt.s32.totalorder %s127_s26, %s2568_s2  ;;  %p2571_p1 = scmp.lt.s32.totalorder %s2569_s3, %s2562_s29 }
  0x15   : > { %p2566_p13 = pneg %p2565_p12 }
  0x16   : > { %p2572_p2 = por %p2571_p1, %p2570_p0 }
  0x18   : > { %p2573_p3 = pnand %p2572_p2, %p2566_p13 }
  0x1a   : > { %2576 = shalt.err (!%p2573_p3)
}
  0x1b   : > { %s2630_s4 = smov 128   ;;  %s2631_s5 = smov 8  }
  0x1c   : > { %2464 = dma.hbm_to_vmem [thread:$0]  (!%p2733_p9), %s125_s24, 1024, %s127_s26, %s112_s28, %s2630_s4, %s2630_s4, %s2631_s5  }
  0x1d   : > { %p2445_p4 = scmp.ge.s32.totalorder %s2627_s11, 1  ;;  %p134_p5 = scmp.lt.s32.totalorder %s2627_s11, 3 }
  0x1f   : > { %p135_p6 = pnand %p2445_p4, %p134_p5 }
  0x21   : > { %138 = sbr.rel (%p135_p6) target bundleno = 752 (0x2f0), region = 24 }
  0x26   : > { %s140_s6 = sand.u32 1, %s2611_s7  }
  0x27   : > { %s2446_s12 = sshll.u32 %s140_s6, 6  ;;  %s141_s14 = scalar_lea.sflag [#allocation3], %s140_s6 }
  0x28   : > { %s2744_s15 = scalar_lea.vmem [#allocation2], %s2446_s12 }
  0x29   : > { %2602 = dma.done.wait (%p2718_p7), %s141_s14, 1024  }
  0x2a   : > { %2604 = vsyncadd (%p2718_p7), %s141_s14, 4294966272  ;;  %v2449_v0 = vld [vmem:[%s2744_s15 + $0x20] sm:$0xff]  ;;  %v2453_v1 = vld [vmem:[%s2744_s15 + $0x30] sm:$0xff]  ;;  %s2632_s16 = smov 16   ;;  %v218_v4 = vlaneseq  ;;  %vm199_vm0 = vcmask 130048   ;;  %vm826_vm1 = vcmask 7168  }
  0x2b   : > { %193 = vrot.lane.b32.xlu0 %v2449_v0, %s2632_s16  ;;  %210 = vrot.lane.b32.xlu1 %v2453_v1, %s2632_s16  ;;  %v2450_v2 = vld [vmem:[%s2744_s15 + $0x28] sm:$0xff]  ;;  %v2454_v3 = vld [vmem:[%s2744_s15 + $0x38] sm:$0xff]  ;;  %s2635_s17 = smov 2   ;;  %s2636_s19 = smov 4   ;;  %vm2227_vm2 = vcmask 15360   ;;  %vm2230_vm3 = vcmask 31744  }
  0x2c   : > { %v2758_v5 = vshrl.u32 %v218_v4, 7  ;;  %v186_v6 = vld [vmem:[%s2744_s15] sm:$0xff]  ;;  %v187_v26 = vld [vmem:[%s2744_s15 + $0x8] sm:$0xff]  ;;  %v2451_v42 = vld [vmem:[%s2744_s15 + $0x10] sm:$0xff]  ;;  %s2637_s20 = smov 6   ;;  %s2638_s21 = smov 8  }
  0x2d   : > { %s2639_s22 = smov 10   ;;  %s2640_s23 = smov 12   ;;  %vm2233_vm4 = vcmask 48128   ;;  %vm2236_vm5 = vcmask 64512   ;;  %vm2239_vm6 = vcmask 80896   ;;  %vm2242_vm7 = vcmask 97280  }
  0x2e   : > { %v2762_v7 = vsub.s32 0, %v2758_v5  ;;  %v2767_v11 = vsub.s32 1, %v2758_v5  ;;  %v2771_v13 = vsub.s32 2, %v2758_v5  ;;  %v2775_v15 = vsub.s32 3, %v2758_v5  ;;  %s2641_s24 = smov 14   ;;  %s2642_s25 = smov 18  }
  0x2f   : > { %195 = vrot.lane.b32.xlu0 %v2450_v2, %s2632_s16  ;;  %212 = vrot.lane.b32.xlu1 %v2454_v3, %s2632_s16  ;;  %v2779_v17 = vsub.s32 4, %v2758_v5  ;;  %v2783_v19 = vsub.s32 5, %v2758_v5  ;;  %v2787_v21 = vsub.s32 6, %v2758_v5  ;;  %v2791_v23 = vsub.s32 7, %v2758_v5  ;;  %s2643_s26 = smov 20   ;;  %s2644_s27 = smov 22  }
  0x30   : > { %s2645_s28 = smov 24   ;;  %s2646_s29 = smov 26   ;;  %vm2245_vm8 = vcmask 113664   ;;  %vm2250_vm9 = vcmask 146432   ;;  %vm2253_vm10 = vcmask 162816   ;;  %vm2256_vm11 = vcmask 179200  }
  0x31   : > { %s2647_s30 = smov 28   ;;  %s2648_s2 = smov 30   ;;  %vm2259_vm12 = vcmask 195584   ;;  %vm2262_vm13 = vcmask 211968   ;;  %vm2265_vm14 = vcmask 228352   ;;  %vm2268_vm15 = vcmask 244736  }
  0x32   : > { %s2649_s3 = smov 32   ;;  %s2650_s4 = smov 34  }
  0x33   : > { %s2651_s5 = smov 36   ;;  %s2652_s6 = smov 38  }
  0x34   : > { %s2653_s12 = smov 40   ;;  %s2654_s14 = smov 42  }
  0x35   : > { %p173_p7 = scmp.lt.s32.totalorder %s2619_s9, 1 }
  0x37   : > { %s3938_s9 = smov (!%p173_p7, %s2619_s9), 1 }
  0x9d   : > { %v194_v8 = vpop.permute.xlu0 %193  ;;  %v211_v34 = vpop.permute.xlu1 %210 }
  0x9e   : > { %v200_v9 = vsel %vm199_vm0, %v186_v6, %v194_v8  ;;  %v2820_v45 = vsel %vm199_vm0, %v2451_v42, %v211_v34 }
  0x9f   : > { %v221_v10 = vrot.slane %v200_v9, %v2762_v7  ;;  %v240_v12 = vrot.slane %v200_v9, %v2767_v11  ;;  %v259_v14 = vrot.slane %v200_v9, %v2771_v13  ;;  %v278_v16 = vrot.slane %v200_v9, %v2775_v15 }
  0xa0   : > { %v297_v18 = vrot.slane %v200_v9, %v2779_v17  ;;  %v316_v20 = vrot.slane %v200_v9, %v2783_v19  ;;  %v335_v22 = vrot.slane %v200_v9, %v2787_v21  ;;  %v354_v24 = vrot.slane %v200_v9, %v2791_v23 }
  0xa1   : > { %227 = vbcast.lane.b32.xlu1 %v221_v10, 264  ;;  %223 = vbcast.lane.b32.xlu0 %v221_v10, 256  ;;  %v196_v25 = vpop.permute.xlu0 %195  ;;  %v2802_v35 = vpop.permute.xlu1 %212  ;;  %v525_v48 = vrot.slane %v2820_v45, %v2762_v7  ;;  %v544_v53 = vrot.slane %v2820_v45, %v2767_v11  ;;  %v563_v58 = vrot.slane %v2820_v45, %v2771_v13 }
  0xa2   : > { %v201_v27 = vsel %vm199_vm0, %v187_v26, %v196_v25  ;;  %v582_v63 = vrot.slane %v2820_v45, %v2775_v15  ;;  %v601_v4 = vrot.slane %v2820_v45, %v2779_v17 }
  0xa3   : > { %v373_v28 = vrot.slane %v201_v27, %v2762_v7  ;;  %v392_v29 = vrot.slane %v201_v27, %v2767_v11  ;;  %v411_v30 = vrot.slane %v201_v27, %v2771_v13  ;;  %v430_v31 = vrot.slane %v201_v27, %v2775_v15 }
  0xa4   : > { %v449_v32 = vrot.slane %v201_v27, %v2779_v17  ;;  %v468_v33 = vrot.slane %v201_v27, %v2783_v19  ;;  %v487_v36 = vrot.slane %v201_v27, %v2787_v21  ;;  %v506_v41 = vrot.slane %v201_v27, %v2791_v23 }
  0xa5   : > { %235 = vbcast.lane.b32.xlu1 %v221_v10, 280  ;;  %231 = vbcast.lane.b32.xlu0 %v221_v10, 272 }
  0xa9   : > { %246 = vbcast.lane.b32.xlu1 %v240_v12, 264  ;;  %242 = vbcast.lane.b32.xlu0 %v240_v12, 256 }
  0xad   : > { %254 = vbcast.lane.b32.xlu1 %v240_v12, 280  ;;  %250 = vbcast.lane.b32.xlu0 %v240_v12, 272  ;;  %v620_v12 = vrot.slane %v2820_v45, %v2783_v19 }
  0xb1   : > { %265 = vbcast.lane.b32.xlu1 %v259_v14, 264  ;;  %261 = vbcast.lane.b32.xlu0 %v259_v14, 256 }
  0xb5   : > { %273 = vbcast.lane.b32.xlu1 %v259_v14, 280  ;;  %269 = vbcast.lane.b32.xlu0 %v259_v14, 272 }
  0xb9   : > { %284 = vbcast.lane.b32.xlu1 %v278_v16, 264  ;;  %280 = vbcast.lane.b32.xlu0 %v278_v16, 256 }
  0xbd   : > { %292 = vbcast.lane.b32.xlu1 %v278_v16, 280  ;;  %288 = vbcast.lane.b32.xlu0 %v278_v16, 272 }
  0xc1   : > { %303 = vbcast.lane.b32.xlu1 %v297_v18, 264  ;;  %299 = vbcast.lane.b32.xlu0 %v297_v18, 256 }
  0xc5   : > { %311 = vbcast.lane.b32.xlu1 %v297_v18, 280  ;;  %307 = vbcast.lane.b32.xlu0 %v297_v18, 272 }
  0xc9   : > { %322 = vbcast.lane.b32.xlu1 %v316_v20, 264  ;;  %318 = vbcast.lane.b32.xlu0 %v316_v20, 256 }
  0xcd   : > { %330 = vbcast.lane.b32.xlu1 %v316_v20, 280  ;;  %326 = vbcast.lane.b32.xlu0 %v316_v20, 272 }
  0xd1   : > { %341 = vbcast.lane.b32.xlu1 %v335_v22, 264  ;;  %337 = vbcast.lane.b32.xlu0 %v335_v22, 256 }
  0xd5   : > { %349 = vbcast.lane.b32.xlu1 %v335_v22, 280  ;;  %345 = vbcast.lane.b32.xlu0 %v335_v22, 272  ;;  %v639_v22 = vrot.slane %v2820_v45, %v2787_v21 }
  0xd9   : > { %360 = vbcast.lane.b32.xlu1 %v354_v24, 264  ;;  %356 = vbcast.lane.b32.xlu0 %v354_v24, 256 }
  0xdd   : > { %368 = vbcast.lane.b32.xlu1 %v354_v24, 280  ;;  %364 = vbcast.lane.b32.xlu0 %v354_v24, 272 }
  0xe1   : > { %379 = vbcast.lane.b32.xlu1 %v373_v28, 264  ;;  %375 = vbcast.lane.b32.xlu0 %v373_v28, 256 }
  0xe5   : > { %387 = vbcast.lane.b32.xlu1 %v373_v28, 280  ;;  %383 = vbcast.lane.b32.xlu0 %v373_v28, 272  ;;  %v658_v28 = vrot.slane %v2820_v45, %v2791_v23 }
  0xe9   : > { %398 = vbcast.lane.b32.xlu1 %v392_v29, 264  ;;  %394 = vbcast.lane.b32.xlu0 %v392_v29, 256 }
  0xed   : > { %406 = vbcast.lane.b32.xlu1 %v392_v29, 280  ;;  %402 = vbcast.lane.b32.xlu0 %v392_v29, 272  ;;  %v2452_v29 = vld [vmem:[%s2744_s15 + $0x18] sm:$0xff]  ;;  %s2655_s15 = smov 44  }
  0xf1   : > { %417 = vbcast.lane.b32.xlu1 %v411_v30, 264  ;;  %413 = vbcast.lane.b32.xlu0 %v411_v30, 256 }
  0xf5   : > { %425 = vbcast.lane.b32.xlu1 %v411_v30, 280  ;;  %421 = vbcast.lane.b32.xlu0 %v411_v30, 272 }
  0xf9   : > { %436 = vbcast.lane.b32.xlu1 %v430_v31, 264  ;;  %432 = vbcast.lane.b32.xlu0 %v430_v31, 256 }
  0xfd   : > { %444 = vbcast.lane.b32.xlu1 %v430_v31, 280  ;;  %440 = vbcast.lane.b32.xlu0 %v430_v31, 272 }
 0x101   : > { %455 = vbcast.lane.b32.xlu1 %v449_v32, 264  ;;  %451 = vbcast.lane.b32.xlu0 %v449_v32, 256 }
 0x105   : > { %463 = vbcast.lane.b32.xlu1 %v449_v32, 280  ;;  %459 = vbcast.lane.b32.xlu0 %v449_v32, 272  ;;  %v217_v32 = vsel %vm199_vm0, %v2452_v29, %v2802_v35 }
 0x106   : > { %v696_v35 = vrot.slane %v217_v32, %v2767_v11  ;;  %v734_v29 = vrot.slane %v217_v32, %v2775_v15 }
 0x109   : > { %474 = vbcast.lane.b32.xlu1 %v468_v33, 264  ;;  %470 = vbcast.lane.b32.xlu0 %v468_v33, 256 }
 0x10d   : > { %482 = vbcast.lane.b32.xlu1 %v468_v33, 280  ;;  %478 = vbcast.lane.b32.xlu0 %v468_v33, 272 }
 0x111   : > { %493 = vbcast.lane.b32.xlu1 %v487_v36, 264  ;;  %489 = vbcast.lane.b32.xlu0 %v487_v36, 256 }
 0x113   : > { %v2805_v37 = vpop.permute.xlu1 %227  ;;  %v2807_v38 = vpop.permute.xlu0 %223 }
 0x115   : > { %501 = vbcast.lane.b32.xlu1 %v487_v36, 280  ;;  %497 = vbcast.lane.b32.xlu0 %v487_v36, 272  ;;  %v677_v36 = vrot.slane %v217_v32, %v2762_v7 }
 0x117   : > { %v2809_v39 = vpop.permute.xlu1 %235  ;;  %v2811_v40 = vpop.permute.xlu0 %231 }
 0x118   : > { %3831 = vst [vmem:[#allocation5_spill] sm:$0xff] %v2809_v39 }
 0x119   : > { %512 = vbcast.lane.b32.xlu1 %v506_v41, 264  ;;  %508 = vbcast.lane.b32.xlu0 %v506_v41, 256 }
 0x11b   : > { %v2815_v43 = vpop.permute.xlu1 %246  ;;  %v2817_v44 = vpop.permute.xlu0 %242 }
 0x11d   : > { %520 = vbcast.lane.b32.xlu1 %v506_v41, 280  ;;  %516 = vbcast.lane.b32.xlu0 %v506_v41, 272 }
 0x11f   : > { %v2822_v46 = vpop.permute.xlu1 %254  ;;  %v2824_v47 = vpop.permute.xlu0 %250 }
 0x120   : > { %3832 = vst [vmem:[#allocation6_spill] sm:$0xff] %v2822_v46  ;;  %3833 = vst [vmem:[#allocation7_spill] sm:$0xff] %v2824_v47 }
 0x121   : > { %531 = vbcast.lane.b32.xlu1 %v525_v48, 264  ;;  %527 = vbcast.lane.b32.xlu0 %v525_v48, 256 }
 0x123   : > { %v2828_v49 = vpop.permute.xlu1 %265  ;;  %v2830_v50 = vpop.permute.xlu0 %261 }
 0x125   : > { %539 = vbcast.lane.b32.xlu1 %v525_v48, 280  ;;  %535 = vbcast.lane.b32.xlu0 %v525_v48, 272 }
 0x127   : > { %v2832_v51 = vpop.permute.xlu1 %273  ;;  %v2834_v52 = vpop.permute.xlu0 %269 }
 0x128   : > { %3834 = vst [vmem:[#allocation8_spill] sm:$0xff] %v2832_v51 }
 0x129   : > { %550 = vbcast.lane.b32.xlu1 %v544_v53, 264  ;;  %546 = vbcast.lane.b32.xlu0 %v544_v53, 256 }
 0x12b   : > { %v2838_v54 = vpop.permute.xlu1 %284  ;;  %v2840_v55 = vpop.permute.xlu0 %280 }
 0x12d   : > { %558 = vbcast.lane.b32.xlu1 %v544_v53, 280  ;;  %554 = vbcast.lane.b32.xlu0 %v544_v53, 272 }
 0x12f   : > { %v2842_v56 = vpop.permute.xlu1 %292  ;;  %v2844_v57 = vpop.permute.xlu0 %288 }
 0x130   : > { %3835 = vst [vmem:[#allocation9_spill] sm:$0xff] %v2842_v56  ;;  %3836 = vst [vmem:[#allocation10_spill] sm:$0xff] %v2844_v57 }
 0x131   : > { %569 = vbcast.lane.b32.xlu1 %v563_v58, 264  ;;  %565 = vbcast.lane.b32.xlu0 %v563_v58, 256 }
 0x133   : > { %v2848_v59 = vpop.permute.xlu1 %303  ;;  %v2850_v60 = vpop.permute.xlu0 %299 }
 0x135   : > { %577 = vbcast.lane.b32.xlu1 %v563_v58, 280  ;;  %573 = vbcast.lane.b32.xlu0 %v563_v58, 272 }
 0x137   : > { %v2852_v61 = vpop.permute.xlu1 %311  ;;  %v2854_v62 = vpop.permute.xlu0 %307 }
 0x138   : > { %3837 = vst [vmem:[#allocation11_spill] sm:$0xff] %v2852_v61  ;;  %3838 = vst [vmem:[#allocation12_spill] sm:$0xff] %v2854_v62 }
 0x139   : > { %588 = vbcast.lane.b32.xlu1 %v582_v63, 264  ;;  %584 = vbcast.lane.b32.xlu0 %v582_v63, 256 }
 0x13b   : > { %v2858_v0 = vpop.permute.xlu1 %322  ;;  %v2860_v1 = vpop.permute.xlu0 %318 }
 0x13d   : > { %596 = vbcast.lane.b32.xlu1 %v582_v63, 280  ;;  %592 = vbcast.lane.b32.xlu0 %v582_v63, 272 }
 0x13f   : > { %v2862_v2 = vpop.permute.xlu1 %330  ;;  %v2864_v3 = vpop.permute.xlu0 %326 }
 0x140   : > { %3839 = vst [vmem:[#allocation13_spill] sm:$0xff] %v2862_v2  ;;  %3840 = vst [vmem:[#allocation14_spill] sm:$0xff] %v2864_v3 }
 0x141   : > { %607 = vbcast.lane.b32.xlu1 %v601_v4, 264  ;;  %603 = vbcast.lane.b32.xlu0 %v601_v4, 256 }
 0x143   : > { %v2868_v6 = vpop.permute.xlu1 %341  ;;  %v2870_v8 = vpop.permute.xlu0 %337 }
 0x145   : > { %615 = vbcast.lane.b32.xlu1 %v601_v4, 280  ;;  %611 = vbcast.lane.b32.xlu0 %v601_v4, 272  ;;  %v715_v4 = vrot.slane %v217_v32, %v2771_v13  ;;  %v753_v13 = vrot.slane %v217_v32, %v2779_v17 }
 0x147   : > { %v2872_v9 = vpop.permute.xlu1 %349  ;;  %v2874_v10 = vpop.permute.xlu0 %345 }
 0x148   : > { %3841 = vst [vmem:[#allocation15_spill] sm:$0xff] %v2872_v9  ;;  %3842 = vst [vmem:[#allocation16_spill] sm:$0xff] %v2874_v10  ;;  %v810_v9 = vrot.slane %v217_v32, %v2791_v23 }
 0x149   : > { %626 = vbcast.lane.b32.xlu1 %v620_v12, 264  ;;  %622 = vbcast.lane.b32.xlu0 %v620_v12, 256 }
 0x14b   : > { %v2878_v14 = vpop.permute.xlu1 %360  ;;  %v2880_v16 = vpop.permute.xlu0 %356 }
 0x14d   : > { %634 = vbcast.lane.b32.xlu1 %v620_v12, 280  ;;  %630 = vbcast.lane.b32.xlu0 %v620_v12, 272 }
 0x14f   : > { %v2882_v18 = vpop.permute.xlu1 %368  ;;  %v2884_v20 = vpop.permute.xlu0 %364 }
 0x150   : > { %3843 = vst [vmem:[#allocation17_spill] sm:$0xff] %v2882_v18 }
 0x151   : > { %645 = vbcast.lane.b32.xlu1 %v639_v22, 264  ;;  %641 = vbcast.lane.b32.xlu0 %v639_v22, 256 }
 0x153   : > { %v2888_v24 = vpop.permute.xlu1 %379  ;;  %v2890_v25 = vpop.permute.xlu0 %375 }
 0x154   : > { %3844 = vst [vmem:[#allocation18_spill] sm:$0xff] %v2888_v24 }
 0x155   : > { %653 = vbcast.lane.b32.xlu1 %v639_v22, 280  ;;  %649 = vbcast.lane.b32.xlu0 %v639_v22, 272 }
 0x157   : > { %v2892_v26 = vpop.permute.xlu1 %387  ;;  %v2894_v27 = vpop.permute.xlu0 %383 }
 0x159   : > { %664 = vbcast.lane.b32.xlu1 %v658_v28, 264  ;;  %660 = vbcast.lane.b32.xlu0 %v658_v28, 256 }
 0x15b   : > { %v2899_v30 = vpop.permute.xlu1 %398  ;;  %v2901_v31 = vpop.permute.xlu0 %394 }
 0x15c   : > { %3845 = vst [vmem:[#allocation19_spill] sm:$0xff] %v2899_v30 }
 0x15d   : > { %672 = vbcast.lane.b32.xlu1 %v658_v28, 280  ;;  %668 = vbcast.lane.b32.xlu0 %v658_v28, 272 }
 0x15f   : > { %v2905_v33 = vpop.permute.xlu1 %406  ;;  %v2907_v34 = vpop.permute.xlu0 %402 }
 0x160   : > { %3846 = vst [vmem:[#allocation20_spill] sm:$0xff] %v2905_v33 }
 0x161   : > { %683 = vbcast.lane.b32.xlu1 %v677_v36, 264  ;;  %679 = vbcast.lane.b32.xlu0 %v677_v36, 256 }
 0x163   : > { %v2910_v41 = vpop.permute.xlu1 %417  ;;  %v2912_v42 = vpop.permute.xlu0 %413 }
 0x164   : > { %3847 = vst [vmem:[#allocation21_spill] sm:$0xff] %v2910_v41 }
 0x165   : > { %691 = vbcast.lane.b32.xlu1 %v677_v36, 280  ;;  %687 = vbcast.lane.b32.xlu0 %v677_v36, 272 }
 0x167   : > { %v2914_v45 = vpop.permute.xlu1 %425  ;;  %v2916_v48 = vpop.permute.xlu0 %421 }
 0x169   : > { %702 = vbcast.lane.b32.xlu1 %v696_v35, 264  ;;  %698 = vbcast.lane.b32.xlu0 %v696_v35, 256 }
 0x16b   : > { %v2919_v53 = vpop.permute.xlu1 %436  ;;  %v2921_v58 = vpop.permute.xlu0 %432 }
 0x16c   : > { %3848 = vst [vmem:[#allocation22_spill] sm:$0xff] %v2919_v53  ;;  %v2633_v53 = vmov 1983009808  }
 0x16d   : > { %710 = vbcast.lane.b32.xlu1 %v696_v35, 280  ;;  %706 = vbcast.lane.b32.xlu0 %v696_v35, 272 }
 0x16f   : > { %v2923_v7 = vpop.permute.xlu1 %444  ;;  %v2925_v63 = vpop.permute.xlu0 %440 }
 0x170   : > { %3849 = vst [vmem:[#allocation23_spill] sm:$0xff] %v2923_v7 }
 0x171   : > { %721 = vbcast.lane.b32.xlu1 %v715_v4, 264  ;;  %717 = vbcast.lane.b32.xlu0 %v715_v4, 256 }
 0x173   : > { %v2928_v12 = vpop.permute.xlu1 %455  ;;  %v2930_v22 = vpop.permute.xlu0 %451 }
 0x174   : > { %3850 = vst [vmem:[#allocation24_spill] sm:$0xff] %v2928_v12 }
 0x175   : > { %729 = vbcast.lane.b32.xlu1 %v715_v4, 280  ;;  %725 = vbcast.lane.b32.xlu0 %v715_v4, 272  ;;  %v791_v4 = vrot.slane %v217_v32, %v2787_v21 }
 0x177   : > { %v2932_v11 = vpop.permute.xlu1 %463  ;;  %v2934_v28 = vpop.permute.xlu0 %459 }
 0x178   : > { %3851 = vst [vmem:[#allocation25_spill] sm:$0xff] %v2932_v11  ;;  %3852 = vst [vmem:[#allocation26_spill] sm:$0xff] %v2934_v28  ;;  %v772_v11 = vrot.slane %v217_v32, %v2783_v19 }
 0x179   : > { %740 = vbcast.lane.b32.xlu1 %v734_v29, 264  ;;  %736 = vbcast.lane.b32.xlu0 %v734_v29, 256 }
 0x17b   : > { %v2937_v36 = vpop.permute.xlu1 %474  ;;  %v2939_v35 = vpop.permute.xlu0 %470 }
 0x17c   : > { %3853 = vst [vmem:[#allocation27_spill] sm:$0xff] %v2937_v36 }
 0x17d   : > { %755 = vbcast.lane.b32.xlu1 %v753_v13, 256  ;;  %744 = vbcast.lane.b32.xlu0 %v734_v29, 272 }
 0x17f   : > { %v2942_v39 = vpop.permute.xlu1 %482  ;;  %v2944_v61 = vpop.permute.xlu0 %478 }
 0x180   : > { %3854 = vst [vmem:[#allocation28_spill] sm:$0xff] %v2942_v39  ;;  %3855 = vst [vmem:[#allocation29_spill] sm:$0xff] %v2944_v61 }
 0x181   : > { %793 = vbcast.lane.b32.xlu1 %v791_v4, 256  ;;  %774 = vbcast.lane.b32.xlu0 %v772_v11, 256 }
 0x183   : > { %v2948_v15 = vpop.permute.xlu1 %493  ;;  %v2950_v28 = vpop.permute.xlu0 %489 }
 0x184   : > { %3856 = vst [vmem:[#allocation30_spill] sm:$0xff] %v2948_v15 }
 0x185   : > { %759 = vbcast.lane.b32.xlu1 %v753_v13, 264  ;;  %812 = vbcast.lane.b32.xlu0 %v810_v9, 256 }
 0x187   : > { %v2953_v17 = vpop.permute.xlu1 %501  ;;  %v2955_v2 = vpop.permute.xlu0 %497 }
 0x188   : > { %3857 = vst [vmem:[#allocation31_spill] sm:$0xff] %v2953_v17  ;;  %3858 = vst [vmem:[#allocation32_spill] sm:$0xff] %v2955_v2 }
 0x189   : > { %797 = vbcast.lane.b32.xlu1 %v791_v4, 264  ;;  %778 = vbcast.lane.b32.xlu0 %v772_v11, 264 }
 0x18b   : > { %v2957_v39 = vpop.permute.xlu1 %512  ;;  %v2959_v21 = vpop.permute.xlu0 %508 }
 0x18c   : > { %3859 = vst [vmem:[#allocation33_spill] sm:$0xff] %v2957_v39  ;;  %v894_v39 = vunpack.c.l.s4 %v2633_v53 }
 0x18d   : > { %763 = vbcast.lane.b32.xlu1 %v753_v13, 272  ;;  %816 = vbcast.lane.b32.xlu0 %v810_v9, 264 }
 0x18e   : > { %v895_v62 = vunpack.c.0.s8 %v894_v39 }
 0x18f   : > { %v2961_v19 = vpop.permute.xlu1 %520  ;;  %v2963_v61 = vpop.permute.xlu0 %516 }
 0x190   : > { %3860 = vst [vmem:[#allocation34_spill] sm:$0xff] %v2961_v19  ;;  %3861 = vst [vmem:[#allocation35_spill] sm:$0xff] %v2963_v61  ;;  %v3018_v39 = vsub.s32 %v895_v62, %v2758_v5 }
 0x191   : > { %801 = vbcast.lane.b32.xlu1 %v791_v4, 272  ;;  %782 = vbcast.lane.b32.xlu0 %v772_v11, 272 }
 0x193   : > { %v2965_v23 = vpop.permute.xlu1 %531  ;;  %v528_v32 = vpop.permute.xlu0 %527 }
 0x194   : > { %v827_v57 = vsel %vm826_vm1, %v2807_v38, %v528_v32 }
 0x195   : > { %748 = vbcast.lane.b32.xlu1 %v734_v29, 280  ;;  %820 = vbcast.lane.b32.xlu0 %v810_v9, 272 }
 0x197   : > { %v2967_v17 = vpop.permute.xlu1 %539  ;;  %v2969_v2 = vpop.permute.xlu0 %535 }
 0x198   : > { %3862 = vst [vmem:[#allocation36_spill] sm:$0xff] %v2967_v17 }
 0x199   : > { %786 = vbcast.lane.b32.xlu1 %v772_v11, 280  ;;  %767 = vbcast.lane.b32.xlu0 %v753_v13, 280 }
 0x19b   : > { %v2971_v56 = vpop.permute.xlu1 %550  ;;  %v547_v51 = vpop.permute.xlu0 %546 }
 0x19d   : > { %824 = vbcast.lane.b32.xlu1 %v810_v9, 280  ;;  %805 = vbcast.lane.b32.xlu0 %v791_v4, 280 }
 0x19f   : > { %v2973_v19 = vpop.permute.xlu1 %558  ;;  %v2975_v61 = vpop.permute.xlu0 %554 }
 0x1a0   : > { %3863 = vst [vmem:[#allocation37_spill] sm:$0xff] %v2973_v19  ;;  %3864 = vst [vmem:[#allocation38_spill] sm:$0xff] %v2975_v61 }
 0x1a3   : > { %v2977_v18 = vpop.permute.xlu1 %569  ;;  %v566_v46 = vpop.permute.xlu0 %565 }
 0x1a7   : > { %v2979_v29 = vpop.permute.xlu1 %577  ;;  %v2981_v24 = vpop.permute.xlu0 %573 }
 0x1a8   : > { %3865 = vst [vmem:[#allocation39_spill] sm:$0xff] %v2979_v29 }
 0x1ab   : > { %v2983_v17 = vpop.permute.xlu1 %588  ;;  %v585_v11 = vpop.permute.xlu0 %584 }
 0x1ac   : > { %v839_v33 = vsel %vm826_vm1, %v2840_v55, %v585_v11 }
 0x1af   : > { %v2985_v13 = vpop.permute.xlu1 %596  ;;  %v2987_v12 = vpop.permute.xlu0 %592 }
 0x1b0   : > { %3866 = vst [vmem:[#allocation40_spill] sm:$0xff] %v2985_v13  ;;  %3867 = vst [vmem:[#allocation41_spill] sm:$0xff] %v2987_v12 }
 0x1b3   : > { %v2989_v9 = vpop.permute.xlu1 %607  ;;  %v604_v4 = vpop.permute.xlu0 %603 }
 0x1b7   : > { %v2991_v19 = vpop.permute.xlu1 %615  ;;  %v2993_v41 = vpop.permute.xlu0 %611 }
 0x1b8   : > { %3868 = vst [vmem:[#allocation42_spill] sm:$0xff] %v2991_v19  ;;  %3869 = vst [vmem:[#allocation43_spill] sm:$0xff] %v2993_v41  ;;  %v2634_v19 = vmov 1934713408   ;;  %v831_v41 = vsel %vm826_vm1, %v2817_v44, %v547_v51  ;;  %v843_v44 = vsel %vm826_vm1, %v2850_v60, %v604_v4 }
 0x1b9   : > { %v958_v10 = vunpack.c.l.s4 %v2634_v19  ;;  %v907_v53 = vcombine.low %v831_v41, %v839_v33  ;;  %v908_v47 = vcombine.high %v831_v41, %v839_v33 }
 0x1bb   : > { %v2995_v30 = vpop.permute.xlu1 %626  ;;  %v623_v36 = vpop.permute.xlu0 %622  ;;  %v959_v11 = vunpack.c.0.s8 %v958_v10  ;;  %v915_v51 = vrot.slane %v907_v53, %v3018_v39 }
 0x1bd   : > { %v3034_v60 = vsub.s32 %v959_v11, %v2758_v5 }
 0x1bf   : > { %v2997_v29 = vpop.permute.xlu1 %634  ;;  %v2999_v15 = vpop.permute.xlu0 %630 }
 0x1c0   : > { %3870 = vst [vmem:[#allocation44_spill] sm:$0xff] %v2997_v29  ;;  %3871 = vst [vmem:[#allocation45_spill] sm:$0xff] %v2999_v15  ;;  %v835_v29 = vsel %vm826_vm1, %v2830_v50, %v566_v46 }
 0x1c1   : > { %v891_v19 = vcombine.low %v827_v57, %v835_v29  ;;  %v892_v5 = vcombine.high %v827_v57, %v835_v29 }
 0x1c3   : > { %v3001_v7 = vpop.permute.xlu1 %645  ;;  %v642_v13 = vpop.permute.xlu0 %641  ;;  %v899_v62 = vrot.slane %v891_v19, %v3018_v39  ;;  %v906_v57 = vrot.slane %v892_v5, %v3018_v39 }
 0x1c4   : > { %v851_v55 = vsel %vm826_vm1, %v2870_v8, %v642_v13  ;;  %v3079_v5 = vsel %vm826_vm1, %v2868_v6, %v3001_v7 }
 0x1c5   : > { %v955_v4 = vcombine.low %v899_v62, %v915_v51  ;;  %v956_v19 = vcombine.high %v899_v62, %v915_v51 }
 0x1c7   : > { %v3009_v3 = vpop.permute.xlu1 %653  ;;  %v3011_v15 = vpop.permute.xlu0 %649  ;;  %v970_v51 = vrot.slane %v956_v19, %v3034_v60 }
 0x1c8   : > { %3872 = vst [vmem:[#allocation46_spill] sm:$0xff] %v3009_v3  ;;  %3873 = vst [vmem:[#allocation47_spill] sm:$0xff] %v3011_v15  ;;  %v847_v3 = vsel %vm826_vm1, %v2860_v1, %v623_v36  ;;  %v923_v15 = vcombine.low %v843_v44, %v851_v55 }
 0x1ca   : > { %v931_v53 = vrot.slane %v923_v15, %v3018_v39 }
 0x1cb   : > { %v665_v46 = vpop.permute.xlu1 %664  ;;  %v661_v50 = vpop.permute.xlu0 %660 }
 0x1cc   : > { %v855_v38 = vsel %vm826_vm1, %v2880_v16, %v661_v50 }
 0x1cd   : > { %v939_v8 = vcombine.low %v847_v3, %v855_v38  ;;  %v940_v1 = vcombine.high %v847_v3, %v855_v38  ;;  %v922_v38 = vrot.slane %v908_v47, %v3018_v39 }
 0x1cf   : > { %v947_v32 = vrot.slane %v939_v8, %v3018_v39  ;;  %v3029_v10 = vpop.permute.xlu1 %672  ;;  %v3031_v13 = vpop.permute.xlu0 %668  ;;  %v3042_v8 = vrot.slane %v955_v4, %v3034_v60  ;;  %v954_v11 = vrot.slane %v940_v1, %v3018_v39 }
 0x1d0   : > { %3874 = vst [vmem:[#allocation48_spill] sm:$0xff] %v3029_v10  ;;  %v924_v10 = vcombine.high %v843_v44, %v851_v55 }
 0x1d1   : > { %v987_v36 = vcombine.low %v931_v53, %v947_v32  ;;  %v988_v12 = vcombine.high %v931_v53, %v947_v32  ;;  %v971_v32 = vcombine.low %v906_v57, %v922_v38 }
 0x1d2   : > { %v938_v62 = vrot.slane %v924_v10, %v3018_v39  ;;  %v3064_v10 = vsel %vm826_vm1, %v2878_v14, %v665_v46  ;;  %v832_v14 = vsel %vm826_vm1, %v2815_v43, %v2971_v56  ;;  %v3088_v46 = vsel %vm826_vm1, %v2858_v0, %v2995_v30 }
 0x1d3   : > { %v3037_v16 = vpop.permute.xlu1 %683  ;;  %v3039_v50 = vpop.permute.xlu0 %679  ;;  %v3045_v61 = vrot.slane %v987_v36, %v3034_v60  ;;  %v1002_v3 = vrot.slane %v988_v12, %v3034_v60  ;;  %v3073_v36 = vsel %vm826_vm1, %v2838_v54, %v2983_v17  ;;  %v979_v19 = vrot.slane %v971_v32, %v3034_v60 }
 0x1d4   : > { %v1003_v29 = vcombine.low %v938_v62, %v954_v11  ;;  %v3093_v54 = vsel %vm826_vm1, %v2848_v59, %v2989_v9  ;;  %v1211_v6 = vcombine.low %v3088_v46, %v3064_v10  ;;  %v1004_v7 = vcombine.high %v938_v62, %v954_v11 }
 0x1d5   : > { %v1020_v33 = vcombine.high %v3042_v8, %v3045_v61  ;;  %v1021_v55 = vcombine.low %v970_v51, %v1002_v3  ;;  %v1022_v4 = vcombine.high %v970_v51, %v1002_v3  ;;  %v836_v3 = vsel %vm826_vm1, %v2828_v49, %v2977_v18 }
 0x1d6   : > { %v1011_v47 = vrot.slane %v1003_v29, %v3034_v60  ;;  %v1179_v43 = vcombine.low %v832_v14, %v3073_v36  ;;  %v972_v56 = vcombine.high %v906_v57, %v922_v38  ;;  %v1195_v0 = vcombine.low %v3093_v54, %v3079_v5 }
 0x1d7   : > { %v692_v41 = vpop.permute.xlu1 %691  ;;  %v688_v15 = vpop.permute.xlu0 %687  ;;  %1981 = vrot.lane.b32.xlu0 %v1020_v33, %s2635_s17  ;;  %v1019_v59 = vcombine.low %v3042_v8, %v3045_v61  ;;  %v828_v9 = vsel %vm826_vm1, %v2805_v37, %v2965_v23  ;;  %v1219_v18 = vrot.slane %v1211_v6, %v3018_v39  ;;  %v1018_v11 = vrot.slane %v1004_v7, %v3034_v60  ;;  %v3918_v8 = vld [vmem:[#allocation28_spill] sm:$0xff] }
 0x1d8   : > { %v1023_v17 = vcombine.low %v979_v19, %v1011_v47  ;;  %v1163_v49 = vcombine.low %v828_v9, %v836_v3  ;;  %v1024_v38 = vcombine.high %v979_v19, %v1011_v47  ;;  %v1187_v51 = vrot.slane %v1179_v43, %v3018_v39 }
 0x1d9   : > { %v986_v62 = vrot.slane %v972_v56, %v3034_v60  ;;  %v1203_v57 = vrot.slane %v1195_v0, %v3018_v39  ;;  %v3118_v32 = vsel %vm826_vm1, %v2892_v26, %v692_v41  ;;  %v861_v37 = vsel %vm826_vm1, %v2894_v27, %v688_v15 }
 0x1da   : > { %v1171_v27 = vrot.slane %v1163_v49, %v3018_v39  ;;  %v1180_v0 = vcombine.high %v832_v14, %v3073_v36 }
 0x1db   : > { %v3056_v44 = vpop.permute.xlu1 %702  ;;  %v3058_v12 = vpop.permute.xlu0 %698  ;;  %1989 = vrot.lane.b32.xlu0 %v1021_v55, %s2636_s19  ;;  %v1259_v15 = vcombine.low %v1203_v57, %v1219_v18  ;;  %v1025_v6 = vcombine.low %v986_v62, %v1018_v11  ;;  %v1026_v56 = vcombine.high %v986_v62, %v1018_v11  ;;  %v1260_v14 = vcombine.high %v1203_v57, %v1219_v18 }
 0x1dd   : > { %v1267_v43 = vrot.slane %v1259_v15, %v3034_v60 }
 0x1df   : > { %v3066_v53 = vpop.permute.xlu1 %710  ;;  %v3068_v1 = vpop.permute.xlu0 %706  ;;  %1997 = vrot.lane.b32.xlu0 %v1022_v4, %s2637_s20 }
 0x1e0   : > { %v865_v62 = vsel %vm826_vm1, %v2907_v34, %v3068_v1 }
 0x1e3   : > { %v3103_v30 = vpop.permute.xlu1 %721  ;;  %v718_v33 = vpop.permute.xlu0 %717  ;;  %2005 = vrot.lane.b32.xlu0 %v1023_v17, %s2638_s21  ;;  %v1227_v17 = vcombine.low %v1171_v27, %v1187_v51 }
 0x1e5   : > { %v1235_v49 = vrot.slane %v1227_v17, %v3034_v60 }
 0x1e7   : > { %v730_v29 = vpop.permute.xlu1 %729  ;;  %v726_v55 = vpop.permute.xlu0 %725  ;;  %2013 = vrot.lane.b32.xlu0 %v1024_v38, %s2639_s22  ;;  %v1228_v38 = vcombine.high %v1171_v27, %v1187_v51  ;;  %v1291_v11 = vcombine.low %v1235_v49, %v1267_v43  ;;  %v1274_v27 = vrot.slane %v1260_v14, %v3034_v60  ;;  %v1292_v15 = vcombine.high %v1235_v49, %v1267_v43 }
 0x1e8   : > { %v3124_v23 = vsel %vm826_vm1, %v2914_v45, %v730_v29  ;;  %v869_v47 = vsel %vm826_vm1, %v2916_v48, %v726_v55  ;;  %v1164_v48 = vcombine.high %v828_v9, %v836_v3  ;;  %v3236_v49 = vsel %vm826_vm1, %v2811_v40, %v2969_v2 }
 0x1e9   : > { %v1843_v4 = vcombine.low %v3118_v32, %v3124_v23  ;;  %v1844_v26 = vcombine.high %v3118_v32, %v3124_v23  ;;  %v1571_v41 = vcombine.low %v861_v37, %v869_v47  ;;  %v1572_v19 = vcombine.high %v861_v37, %v869_v47  ;;  %v3889_v23 = vld [vmem:[#allocation30_spill] sm:$0xff] }
 0x1ea   : > { %v1196_v37 = vcombine.high %v3093_v54, %v3079_v5  ;;  %v1212_v47 = vcombine.high %v3088_v46, %v3064_v10  ;;  %v3150_v36 = vrot.slane %v1164_v48, %v3018_v39  ;;  %v3155_v5 = vrot.slane %v1180_v0, %v3018_v39 }
 0x1eb   : > { %v3134_v45 = vpop.permute.xlu1 %740  ;;  %v737_v7 = vpop.permute.xlu0 %736  ;;  %2021 = vrot.lane.b32.xlu0 %v1025_v6, %s2640_s23  ;;  %v3158_v10 = vrot.slane %v1228_v38, %v3034_v60  ;;  %v3163_v46 = vsel %vm826_vm1, %v2901_v31, %v3058_v12  ;;  %v3194_v1 = vrot.slane %v1571_v41, %v3018_v39  ;;  %v3197_v6 = vrot.slane %v1572_v19, %v3018_v39 }
 0x1ec   : > { %v3147_v3 = vsel %vm826_vm1, %v2921_v58, %v737_v7  ;;  %v3167_v58 = vsel %vm826_vm1, %v2912_v42, %v718_v33  ;;  %v3173_v51 = vrot.slane %v1212_v47, %v3018_v39  ;;  %v3184_v42 = vsel %vm826_vm1, %v2890_v25, %v3039_v50 }
 0x1ed   : > { %v1043_v31 = vcombine.low %v3163_v46, %v3147_v3  ;;  %v1027_v34 = vcombine.low %v3184_v42, %v3167_v58  ;;  %v3246_v47 = vsel %vm826_vm1, %v2884_v20, %v3031_v13  ;;  %v3877_v20 = vld [vmem:[#allocation41_spill] sm:$0xff]  ;;  %v3878_v13 = vld [vmem:[#allocation10_spill] sm:$0xff] }
 0x1ef   : > { %v756_v29 = vpop.permute.xlu1 %755  ;;  %v745_v55 = vpop.permute.xlu0 %744  ;;  %2029 = vrot.lane.b32.xlu0 %v1026_v56, %s2641_s24  ;;  %v3212_v41 = vrot.slane %v1043_v31, %v3018_v39  ;;  %v3880_v31 = vld [vmem:[#allocation14_spill] sm:$0xff] }
 0x1f0   : > { %v873_v9 = vsel %vm826_vm1, %v2925_v63, %v745_v55  ;;  %v3170_v63 = vrot.slane %v1196_v37, %v3018_v39  ;;  %v3201_v25 = vsel %vm826_vm1, %v2930_v22, %v756_v29  ;;  %v1035_v29 = vrot.slane %v1027_v34, %v3018_v39  ;;  %v3882_v34 = vld [vmem:[#allocation16_spill] sm:$0xff] }
 0x1f1   : > { %v1587_v12 = vcombine.low %v865_v62, %v873_v9  ;;  %v1588_v33 = vcombine.high %v865_v62, %v873_v9  ;;  %v3241_v37 = vsel %vm826_vm1, %v2834_v52, %v2981_v24  ;;  %v1243_v9 = vcombine.low %v3150_v36, %v3155_v5  ;;  %v3875_v52 = vld [vmem:[#allocation38_spill] sm:$0xff]  ;;  %v3876_v24 = vld [vmem:[#allocation7_spill] sm:$0xff]  ;;  %v3879_v62 = vld [vmem:[#allocation45_spill] sm:$0xff] }
 0x1f3   : > { %v794_v54 = vpop.permute.xlu1 %793  ;;  %v775_v18 = vpop.permute.xlu0 %774  ;;  %2037 = vrot.lane.b32.xlu0 %v1291_v11, %s2632_s16  ;;  %v3204_v50 = vrot.slane %v1587_v12, %v3018_v39  ;;  %v1091_v11 = vcombine.low %v1035_v29, %v3212_v41  ;;  %v3269_v12 = vsel %vm826_vm1, %v3880_v31, %v3879_v62 }
 0x1f4   : > { %v3188_v57 = vsel %vm826_vm1, %v2950_v28, %v794_v54  ;;  %v3207_v28 = vrot.slane %v1588_v33, %v3018_v39  ;;  %v879_v48 = vsel %vm826_vm1, %v2939_v35, %v775_v18  ;;  %v1275_v35 = vcombine.low %v3170_v63, %v3173_v51  ;;  %v3881_v33 = vld [vmem:[#allocation47_spill] sm:$0xff] }
 0x1f5   : > { %v1059_v19 = vcombine.low %v3201_v25, %v3188_v57  ;;  %v1635_v43 = vcombine.low %v3194_v1, %v3204_v50  ;;  %v1636_v56 = vcombine.high %v3194_v1, %v3204_v50  ;;  %v3259_v54 = vsel %vm826_vm1, %v3876_v24, %v3875_v52  ;;  %v3883_v24 = vld [vmem:[#allocation43_spill] sm:$0xff] }
 0x1f6   : > { %v3264_v18 = vsel %vm826_vm1, %v3878_v13, %v3877_v20  ;;  %v1435_v52 = vcombine.low %v3236_v49, %v3241_v37  ;;  %v3884_v20 = vld [vmem:[#allocation12_spill] sm:$0xff]  ;;  %v3293_v38 = vrot.slane %v1091_v11, %v3034_v60  ;;  %v1276_v11 = vcombine.high %v3170_v63, %v3173_v51 }
 0x1f7   : > { %v3209_v7 = vpop.permute.xlu1 %759  ;;  %v813_v17 = vpop.permute.xlu0 %812  ;;  %2045 = vrot.lane.b32.xlu0 %v1292_v15, %s2642_s25  ;;  %v1067_v40 = vrot.slane %v1059_v19, %v3018_v39  ;;  %v3274_v15 = vsel %vm826_vm1, %v3882_v34, %v3881_v33  ;;  %v1483_v19 = vcombine.low %v3269_v12, %v3246_v47  ;;  %v3285_v13 = vsel %vm826_vm1, %v3884_v20, %v3883_v24 }
 0x1f8   : > { %v887_v22 = vsel %vm826_vm1, %v2959_v21, %v813_v17  ;;  %v1293_v21 = vcombine.low %v3158_v10, %v1274_v27  ;;  %v1283_v17 = vrot.slane %v1275_v35, %v3034_v60  ;;  %v1251_v35 = vrot.slane %v1243_v9, %v3034_v60 }
 0x1f9   : > { %v1075_v55 = vcombine.low %v879_v48, %v887_v22  ;;  %v1076_v62 = vcombine.high %v879_v48, %v887_v22  ;;  %v1467_v34 = vcombine.low %v3285_v13, %v3274_v15  ;;  %v1044_v48 = vcombine.high %v3163_v46, %v3147_v3 }
 0x1fa   : > { %v1092_v22 = vcombine.high %v1035_v29, %v3212_v41  ;;  %v1060_v9 = vcombine.high %v3201_v25, %v3188_v57  ;;  %v1244_v63 = vcombine.high %v3150_v36, %v3155_v5  ;;  %v3337_v36 = vrot.slane %v1435_v52, %v3018_v39 }
 0x1fb   : > { %v3248_v14 = vpop.permute.xlu1 %797  ;;  %v1083_v2 = vrot.slane %v1075_v55, %v3018_v39  ;;  %2053 = vrot.lane.b32.xlu0 %v1293_v21, %s2643_s26  ;;  %v1294_v21 = vcombine.high %v3158_v10, %v1274_v27  ;;  %v1451_v27 = vcombine.low %v3259_v54, %v3264_v18  ;;  %v3316_v3 = vrot.slane %v1076_v62, %v3018_v39  ;;  %v779_v41 = vpop.permute.xlu0 %778 }
 0x1fc   : > { %v3324_v51 = vrot.slane %v1467_v34, %v3018_v39  ;;  %v1106_v25 = vrot.slane %v1092_v22, %v3034_v60  ;;  %v1074_v29 = vrot.slane %v1060_v9, %v3018_v39  ;;  %v1290_v5 = vrot.slane %v1276_v11, %v3034_v60  ;;  %v3886_v11 = vld [vmem:[#allocation23_spill] sm:$0xff] }
 0x1fd   : > { %v1123_v55 = vcombine.low %v1067_v40, %v1083_v2  ;;  %v1124_v31 = vcombine.high %v1067_v40, %v1083_v2  ;;  %v3309_v40 = vrot.slane %v1483_v19, %v3018_v39  ;;  %v1295_v2 = vcombine.low %v1251_v35, %v1283_v17 }
 0x1fe   : > { %v1296_v24 = vcombine.high %v1251_v35, %v1283_v17  ;;  %v1139_v62 = vcombine.low %v1074_v29, %v3316_v3  ;;  %v3885_v17 = vld [vmem:[#allocation20_spill] sm:$0xff] }
 0x1ff   : > { %v3287_v33 = vpop.permute.xlu1 %763  ;;  %v3296_v10 = vrot.slane %v1123_v55, %v3034_v60  ;;  %2061 = vrot.lane.b32.xlu0 %v1294_v21, %s2644_s27  ;;  %v1028_v21 = vcombine.high %v3184_v42, %v3167_v58  ;;  %v1138_v46 = vrot.slane %v1124_v31, %v3034_v60  ;;  %v3329_v58 = vrot.slane %v1451_v27, %v3018_v39  ;;  %v817_v9 = vpop.permute.xlu0 %816 }
 0x200   : > { %v3332_v42 = vrot.slane %v1044_v48, %v3018_v39  ;;  %v1531_v19 = vcombine.low %v3324_v51, %v3309_v40  ;;  %v1258_v48 = vrot.slane %v1244_v63, %v3034_v60  ;;  %v866_v35 = vsel %vm826_vm1, %v3885_v17, %v3066_v53 }
 0x201   : > { %v1156_v55 = vcombine.high %v3293_v38, %v3296_v10  ;;  %v3343_v20 = vrot.slane %v1028_v21, %v3018_v39  ;;  %v1157_v34 = vcombine.low %v1106_v25, %v1138_v46  ;;  %v1499_v52 = vcombine.low %v3337_v36, %v3329_v58 }
 0x202   : > { %v3367_v53 = vrot.slane %v1843_v4, %v3018_v39  ;;  %v1147_v17 = vrot.slane %v1139_v62, %v3034_v60  ;;  %v1158_v27 = vcombine.high %v1106_v25, %v1138_v46  ;;  %v1298_v0 = vcombine.high %v1258_v48, %v1290_v5  ;;  %v3888_v46 = vld [vmem:[#allocation22_spill] sm:$0xff] }
 0x203   : > { %v3319_v57 = vpop.permute.xlu1 %801  ;;  %2069 = vrot.lane.b32.xlu0 %v1295_v2, %s2645_s28  ;;  %1983 = vrot.lane.b32.xlu1 %v1156_v55, %s2635_s17  ;;  %v1107_v22 = vcombine.low %v3343_v20, %v3332_v42  ;;  %v3361_v55 = vrot.slane %v1531_v19, %v3034_v60  ;;  %v3887_v19 = vld [vmem:[#allocation33_spill] sm:$0xff]  ;;  %v3390_v25 = vsel %vm826_vm1, %v3888_v46, %v3134_v45  ;;  %v3894_v46 = vld [vmem:[#allocation18_spill] sm:$0xff]  ;;  %s2657_s17 = smov 48  }
 0x205   : > { %v1115_v32 = vrot.slane %v1107_v22, %v3034_v60 }
 0x207   : > { %v749_v31 = vpop.permute.xlu1 %748  ;;  %2077 = vrot.lane.b32.xlu0 %v1296_v24, %s2646_s29  ;;  %1991 = vrot.lane.b32.xlu1 %v1157_v34, %s2636_s19  ;;  %v1297_v24 = vcombine.low %v1258_v48, %v1290_v5  ;;  %v3378_v34 = vsel %vm826_vm1, %v3887_v19, %v817_v9  ;;  %v3890_v5 = vld [vmem:[#allocation27_spill] sm:$0xff]  ;;  %v3893_v19 = vld [vmem:[#allocation24_spill] sm:$0xff]  ;;  %s2658_s19 = smov 50  }
 0x208   : > { %v874_v2 = vsel %vm826_vm1, %v3886_v11, %v749_v31  ;;  %v3374_v31 = vrot.slane %v1844_v26, %v3018_v39  ;;  %v3396_v26 = vsel %vm826_vm1, %v3889_v23, %v3248_v14  ;;  %v3400_v62 = vsel %vm826_vm1, %v3890_v5, %v779_v41 }
 0x209   : > { %v1859_v21 = vcombine.low %v866_v35, %v874_v2  ;;  %v1860_v63 = vcombine.high %v866_v35, %v874_v2  ;;  %v1140_v14 = vcombine.high %v1074_v29, %v3316_v3  ;;  %v1347_v41 = vcombine.low %v3400_v62, %v3378_v34  ;;  %v3891_v2 = vld [vmem:[#allocation19_spill] sm:$0xff] }
 0x20a   : > { %v1159_v11 = vcombine.low %v1115_v32, %v1147_v17  ;;  %v3428_v3 = vsel %vm826_vm1, %v3893_v19, %v3209_v7  ;;  %v1532_v7 = vcombine.high %v3324_v51, %v3309_v40 }
 0x20b   : > { %v3381_v35 = vrot.slane %v1859_v21, %v3018_v39  ;;  %v3384_v4 = vrot.slane %v1860_v63, %v3018_v39  ;;  %2085 = vrot.lane.b32.xlu0 %v1297_v24, %s2647_s30  ;;  %1999 = vrot.lane.b32.xlu1 %v1158_v27, %s2637_s20  ;;  %v1507_v27 = vrot.slane %v1499_v52, %v3034_v60  ;;  %v3892_v63 = vld [vmem:[#allocation21_spill] sm:$0xff]  ;;  %s2659_s20 = smov 52  }
 0x20c   : > { %v3418_v21 = vsel %vm826_vm1, %v3891_v2, %v3056_v44  ;;  %v3423_v24 = vsel %vm826_vm1, %v3892_v63, %v3103_v30  ;;  %v1108_v44 = vcombine.high %v3343_v20, %v3332_v42  ;;  %v1331_v52 = vcombine.low %v3428_v3, %v3396_v26 }
 0x20d   : > { %v1907_v48 = vcombine.low %v3367_v53, %v3381_v35  ;;  %v1908_v45 = vcombine.high %v3367_v53, %v3381_v35  ;;  %v1923_v22 = vcombine.low %v3374_v31, %v3384_v4  ;;  %v1924_v9 = vcombine.high %v3374_v31, %v3384_v4 }
 0x20e   : > { %v1315_v29 = vcombine.low %v3418_v21, %v3390_v25  ;;  %v1484_v30 = vcombine.high %v3269_v12, %v3246_v47  ;;  %v1563_v23 = vcombine.low %v1507_v27, %v3361_v55  ;;  %v1154_v20 = vrot.slane %v1140_v14, %v3034_v60 }
 0x20f   : > { %2093 = vrot.lane.b32.xlu0 %v1298_v0, %s2648_s2  ;;  %2007 = vrot.lane.b32.xlu1 %v1159_v11, %s2638_s21  ;;  %v3445_v0 = vsel %vm826_vm1, %v3894_v46, %v3037_v16  ;;  %v1355_v5 = vrot.slane %v1347_v41, %v3018_v39  ;;  %v1160_v11 = vcombine.high %v1115_v32, %v1147_v17  ;;  %s2660_s21 = smov 54  }
 0x210   : > { %v1299_v42 = vcombine.low %v3445_v0, %v3423_v24  ;;  %v1452_v47 = vcombine.high %v3259_v54, %v3264_v18  ;;  %v1500_v12 = vcombine.high %v3337_v36, %v3329_v58  ;;  %v1468_v16 = vcombine.high %v3285_v13, %v3274_v15 }
 0x211   : > { %v3460_v40 = vrot.slane %v1315_v29, %v3018_v39  ;;  %v1122_v51 = vrot.slane %v1108_v44, %v3034_v60  ;;  %v1339_v14 = vrot.slane %v1331_v52, %v3018_v39  ;;  %v1436_v54 = vcombine.high %v3236_v49, %v3241_v37  ;;  %v3895_v52 = vld [vmem:[#allocation37_spill] sm:$0xff] }
 0x212   : > { %v3468_v18 = vrot.slane %v1484_v30, %v3018_v39  ;;  %v1546_v15 = vrot.slane %v1532_v7, %v3034_v60  ;;  %v1564_v13 = vcombine.high %v1507_v27, %v3361_v55  ;;  %v1307_v58 = vrot.slane %v1299_v42, %v3018_v39  ;;  %v3896_v30 = vld [vmem:[#allocation6_spill] sm:$0xff]  ;;  %v3897_v42 = vld [vmem:[#allocation48_spill] sm:$0xff] }
 0x213   : > { %2101 = vrot.lane.b32.xlu0 %v1563_v23, %s2649_s3  ;;  %2015 = vrot.lane.b32.xlu1 %v1160_v11, %s2639_s22  ;;  %v1395_v36 = vcombine.low %v1339_v14, %v1355_v5  ;;  %v1161_v17 = vcombine.low %v1122_v51, %v1154_v20  ;;  %v3474_v32 = vrot.slane %v1452_v47, %v3018_v39  ;;  %v3898_v11 = vld [vmem:[#allocation17_spill] sm:$0xff]  ;;  %s2661_s22 = smov 56  }
 0x214   : > { %v1514_v41 = vrot.slane %v1500_v12, %v3034_v60  ;;  %v1482_v2 = vrot.slane %v1468_v16, %v3018_v39  ;;  %v1363_v49 = vcombine.low %v1307_v58, %v3460_v40  ;;  %v1450_v37 = vrot.slane %v1436_v54, %v3018_v39  ;;  %v3900_v54 = vld [vmem:[#allocation8_spill] sm:$0xff] }
 0x215   : > { %v1403_v63 = vrot.slane %v1395_v36, %v3034_v60  ;;  %v1162_v19 = vcombine.high %v1122_v51, %v1154_v20  ;;  %v3491_v7 = vsel %vm826_vm1, %v3896_v30, %v3895_v52  ;;  %v3497_v20 = vsel %vm826_vm1, %v3898_v11, %v3897_v42  ;;  %v3899_v51 = vld [vmem:[#allocation39_spill] sm:$0xff]  ;;  %v3901_v36 = vld [vmem:[#allocation40_spill] sm:$0xff]  ;;  %v3907_v52 = vld [vmem:[#allocation42_spill] sm:$0xff] }
 0x216   : > { %v1547_v55 = vcombine.low %v1482_v2, %v3468_v18  ;;  %v1565_v27 = vcombine.low %v1514_v41, %v1546_v15  ;;  %v1515_v29 = vcombine.low %v1450_v37, %v3474_v32  ;;  %v1371_v44 = vrot.slane %v1363_v49, %v3034_v60  ;;  %v3908_v30 = vld [vmem:[#allocation11_spill] sm:$0xff] }
 0x217   : > { %2109 = vrot.lane.b32.xlu0 %v1564_v13, %s2650_s4  ;;  %2023 = vrot.lane.b32.xlu1 %v1161_v17, %s2640_s23  ;;  %v1566_v23 = vcombine.high %v1514_v41, %v1546_v15  ;;  %v1348_v47 = vcombine.high %v3400_v62, %v3378_v34  ;;  %v1396_v12 = vcombine.high %v1339_v14, %v1355_v5  ;;  %v3902_v17 = vld [vmem:[#allocation9_spill] sm:$0xff]  ;;  %v3903_v41 = vld [vmem:[#allocation44_spill] sm:$0xff]  ;;  %v3905_v34 = vld [vmem:[#allocation46_spill] sm:$0xff]  ;;  %s2662_s23 = smov 58  }
 0x218   : > { %v1555_v46 = vrot.slane %v1547_v55, %v3034_v60  ;;  %v1427_v16 = vcombine.low %v1371_v44, %v1403_v63  ;;  %v3504_v13 = vsel %vm826_vm1, %v3900_v54, %v3899_v51  ;;  %v3509_v49 = vsel %vm826_vm1, %v3902_v17, %v3901_v36  ;;  %v3904_v55 = vld [vmem:[#allocation13_spill] sm:$0xff]  ;;  %v3906_v62 = vld [vmem:[#allocation15_spill] sm:$0xff] }
 0x219   : > { %v1523_v15 = vrot.slane %v1515_v29, %v3034_v60  ;;  %v3521_v5 = vsel %vm826_vm1, %v3906_v62, %v3905_v34  ;;  %v1316_v14 = vcombine.high %v3418_v21, %v3390_v25  ;;  %v1332_v29 = vcombine.high %v3428_v3, %v3396_v26  ;;  %v783_v3 = vpop.permute.xlu0 %782 }
 0x21a   : > { %v3532_v42 = vsel %vm826_vm1, %v3908_v30, %v3907_v52  ;;  %v1548_v11 = vcombine.high %v1482_v2, %v3468_v18  ;;  %v1300_v25 = vcombine.high %v3445_v0, %v3423_v24  ;;  %v1362_v21 = vrot.slane %v1348_v47, %v3018_v39  ;;  %v3909_v18 = vld [vmem:[#allocation36_spill] sm:$0xff]  ;;  %v3910_v2 = vld [vmem:[#allocation5_spill] sm:$0xff] }
 0x21b   : > { %2117 = vrot.lane.b32.xlu0 %v1565_v27, %s2651_s5  ;;  %2031 = vrot.lane.b32.xlu1 %v1162_v19, %s2641_s24  ;;  %v3515_v27 = vsel %vm826_vm1, %v3904_v55, %v3903_v41  ;;  %v1364_v19 = vcombine.high %v1307_v58, %v3460_v40  ;;  %v1567_v51 = vcombine.low %v1523_v15, %v1555_v46  ;;  %s2663_s24 = smov 60  }
 0x21c   : > { %v1410_v26 = vrot.slane %v1396_v12, %v3034_v60  ;;  %v1428_v40 = vcombine.high %v1371_v44, %v1403_v63  ;;  %v1723_v58 = vcombine.low %v3491_v7, %v3509_v49  ;;  %v1739_v54 = vcombine.low %v3532_v42, %v3521_v5 }
 0x21d   : > { %v3550_v24 = vsel %vm826_vm1, %v3910_v2, %v3909_v18  ;;  %v1330_v0 = vrot.slane %v1316_v14, %v3018_v39  ;;  %v1378_v63 = vrot.slane %v1364_v19, %v3034_v60  ;;  %v1346_v44 = vrot.slane %v1332_v29, %v3018_v39  ;;  %v821_v19 = vpop.permute.xlu0 %820 }
 0x21e   : > { %v1562_v47 = vrot.slane %v1548_v11, %v3034_v60  ;;  %v1568_v12 = vcombine.high %v1523_v15, %v1555_v46  ;;  %v1314_v36 = vrot.slane %v1300_v25, %v3018_v39  ;;  %v1731_v55 = vrot.slane %v1723_v58, %v3018_v39  ;;  %v3911_v11 = vld [vmem:[#allocation35_spill] sm:$0xff]  ;;  %v3912_v58 = vld [vmem:[#allocation32_spill] sm:$0xff] }
 0x21f   : > { %2125 = vrot.lane.b32.xlu0 %v1566_v23, %s2652_s6  ;;  %2039 = vrot.lane.b32.xlu1 %v1427_v16, %s2632_s16  ;;  %v1755_v23 = vcombine.low %v3515_v27, %v3497_v20  ;;  %v1516_v16 = vcombine.high %v1450_v37, %v3474_v32  ;;  %v1707_v32 = vcombine.low %v3550_v24, %v3504_v13  ;;  %s2656_s16 = smov 46  }
 0x220   : > { %v1411_v17 = vcombine.low %v1346_v44, %v1362_v21  ;;  %v1429_v41 = vcombine.low %v1378_v63, %v1410_v26  ;;  %v1747_v62 = vrot.slane %v1739_v54, %v3018_v39  ;;  %v1379_v14 = vcombine.low %v1314_v36, %v1330_v0 }
 0x221   : > { %v1763_v37 = vrot.slane %v1755_v23, %v3018_v39  ;;  %v1530_v34 = vrot.slane %v1516_v16, %v3034_v60  ;;  %v1715_v29 = vrot.slane %v1707_v32, %v3018_v39  ;;  %v1430_v30 = vcombine.high %v1378_v63, %v1410_v26  ;;  %v3913_v26 = vld [vmem:[#allocation29_spill] sm:$0xff] }
 0x222   : > { %v1419_v52 = vrot.slane %v1411_v17, %v3034_v60  ;;  %v1387_v25 = vrot.slane %v1379_v14, %v3034_v60  ;;  %v3579_v16 = vsel %vm826_vm1, %v3912_v58, %v3319_v57  ;;  %v881_v54 = vsel %vm826_vm1, %v3913_v26, %v783_v3  ;;  %v3914_v17 = vld [vmem:[#allocation26_spill] sm:$0xff] }
 0x223   : > { %2133 = vrot.lane.b32.xlu0 %v1567_v51, %s2653_s12  ;;  %2047 = vrot.lane.b32.xlu1 %v1428_v40, %s2642_s25  ;;  %v1803_v46 = vcombine.low %v1747_v62, %v1763_v37  ;;  %v1569_v15 = vcombine.low %v1530_v34, %v1562_v47  ;;  %v1771_v23 = vcombine.low %v1715_v29, %v1731_v55  ;;  %s2664_s25 = smov 62  }
 0x224   : > { %v3570_v51 = vsel %vm826_vm1, %v3911_v11, %v821_v19  ;;  %v1570_v18 = vcombine.high %v1530_v34, %v1562_v47  ;;  %v1412_v2 = vcombine.high %v1346_v44, %v1362_v21  ;;  %v1431_v32 = vcombine.low %v1387_v25, %v1419_v52 }
 0x225   : > { %v1811_v40 = vrot.slane %v1803_v46, %v3034_v60  ;;  %v1619_v63 = vcombine.low %v881_v54, %v3570_v51  ;;  %v1380_v57 = vcombine.high %v1314_v36, %v1330_v0  ;;  %v1756_v21 = vcombine.high %v3515_v27, %v3497_v20 }
 0x226   : > { %v1804_v3 = vcombine.high %v1747_v62, %v1763_v37  ;;  %v1426_v47 = vrot.slane %v1412_v2, %v3034_v60  ;;  %v1724_v19 = vcombine.high %v3491_v7, %v3509_v49  ;;  %v1772_v46 = vcombine.high %v1715_v29, %v1731_v55 }
 0x227   : > { %2141 = vrot.lane.b32.xlu0 %v1568_v12, %s2654_s14  ;;  %2055 = vrot.lane.b32.xlu1 %v1429_v41, %s2643_s26  ;;  %v1779_v12 = vrot.slane %v1771_v23, %v3034_v60  ;;  %v3588_v41 = vsel %vm826_vm1, %v3914_v17, %v3287_v33  ;;  %v1627_v34 = vrot.slane %v1619_v63, %v3018_v39  ;;  %v768_v63 = vpop.permute.xlu0 %767  ;;  %s2458_s26 = sshll.u32 %s3938_s9, 4 }
 0x228   : > { %v1603_v14 = vcombine.low %v3588_v41, %v3579_v16  ;;  %v1432_v33 = vcombine.high %v1387_v25, %v1419_v52  ;;  %v1740_v0 = vcombine.high %v3532_v42, %v3521_v5  ;;  %v1394_v36 = vrot.slane %v1380_v57, %v3034_v60 }
 0x229   : > { %v1835_v44 = vcombine.low %v1779_v12, %v1811_v40  ;;  %v1708_v27 = vcombine.high %v3550_v24, %v3504_v13  ;;  %v1770_v37 = vrot.slane %v1756_v21, %v3018_v39  ;;  %v1818_v7 = vrot.slane %v1804_v3, %v3034_v60 }
 0x22a   : > { %v1611_v20 = vrot.slane %v1603_v14, %v3018_v39  ;;  %v1836_v49 = vcombine.high %v1779_v12, %v1811_v40  ;;  %v1433_v62 = vcombine.low %v1394_v36, %v1426_v47  ;;  %v1738_v5 = vrot.slane %v1724_v19, %v3018_v39 }
 0x22b   : > { %2149 = vrot.lane.b32.xlu0 %v1569_v15, %s2655_s15  ;;  %2063 = vrot.lane.b32.xlu1 %v1430_v30, %s2644_s27  ;;  %v1786_v42 = vrot.slane %v1772_v46, %v3034_v60  ;;  %v1754_v29 = vrot.slane %v1740_v0, %v3018_v39  ;;  %v1722_v13 = vrot.slane %v1708_v27, %v3018_v39  ;;  %v806_v3 = vpop.permute.xlu0 %805  ;;  %v3916_v27 = vld [vmem:[#allocation31_spill] sm:$0xff] }
 0x22c   : > { %v1667_v55 = vcombine.low %v1611_v20, %v1627_v34  ;;  %v1434_v30 = vcombine.high %v1394_v36, %v1426_v47  ;;  %v1643_v11 = vrot.slane %v1635_v43, %v3034_v60  ;;  %v1620_v58 = vcombine.high %v881_v54, %v3570_v51  ;;  %v787_v51 = vpop.permute.xlu1 %786  ;;  %v3915_v36 = vld [vmem:[#allocation34_spill] sm:$0xff] }
 0x22d   : > { %v1819_v24 = vcombine.low %v1754_v29, %v1770_v37  ;;  %v1837_v15 = vcombine.low %v1786_v42, %v1818_v7  ;;  %v1787_v23 = vcombine.low %v1722_v13, %v1738_v5  ;;  %v1838_v40 = vcombine.high %v1786_v42, %v1818_v7 }
 0x22e   : > { %v1675_v52 = vrot.slane %v1667_v55, %v3034_v60  ;;  %v1668_v26 = vcombine.high %v1611_v20, %v1627_v34  ;;  %v1820_v43 = vcombine.high %v1754_v29, %v1770_v37  ;;  %v1634_v17 = vrot.slane %v1620_v58, %v3018_v39  ;;  %v3919_v55 = vld [vmem:[#allocation25_spill] sm:$0xff] }
 0x22f   : > { %2157 = vrot.lane.b32.xlu0 %v1570_v18, %s2656_s16  ;;  %2071 = vrot.lane.b32.xlu1 %v1431_v32, %s2645_s28  ;;  %v1827_v25 = vrot.slane %v1819_v24, %v3034_v60  ;;  %v1795_v2 = vrot.slane %v1787_v23, %v3034_v60  ;;  %v1604_v32 = vcombine.high %v3588_v41, %v3579_v16 }
 0x230   : > { %v1699_v18 = vcombine.low %v1643_v11, %v1675_v52  ;;  %v1682_v57 = vrot.slane %v1668_v26, %v3034_v60  ;;  %v1700_v54 = vcombine.high %v1643_v11, %v1675_v52  ;;  %v1788_v14 = vcombine.high %v1722_v13, %v1738_v5  ;;  %v825_v19 = vpop.permute.xlu1 %824 }
 0x231   : > { %v1839_v12 = vcombine.low %v1795_v2, %v1827_v25  ;;  %v1650_v21 = vrot.slane %v1636_v56, %v3034_v60  ;;  %v1618_v16 = vrot.slane %v1604_v32, %v3018_v39  ;;  %v1834_v41 = vrot.slane %v1820_v43, %v3034_v60 }
 0x232   : > { %v890_v20 = vsel %vm826_vm1, %v3915_v36, %v825_v19  ;;  %v886_v37 = vsel %vm826_vm1, %v3916_v27, %v806_v3  ;;  %v3917_v7 = vcombine.low %v3197_v6, %v3207_v28  ;;  %v3920_v58 = vcombine.high %v3197_v6, %v3207_v28 }
 0x233   : > { %2165 = vrot.lane.b32.xlu0 %v1835_v44, %s2657_s17  ;;  %2079 = vrot.lane.b32.xlu1 %v1432_v33, %s2646_s29  ;;  %v1840_v44 = vcombine.high %v1795_v2, %v1827_v25  ;;  %v1683_v47 = vcombine.low %v1618_v16, %v1634_v17  ;;  %v1701_v34 = vcombine.low %v1650_v21, %v1682_v57  ;;  %s3763_s29 = scalar_lea.vmem %s3819_s1, %s2458_s26 }
 0x234   : > { %v1802_v33 = vrot.slane %v1788_v14, %v3034_v60  ;;  %v1702_v0 = vcombine.high %v1650_v21, %v1682_v57  ;;  %v1684_v61 = vcombine.high %v1618_v16, %v1634_v17  ;;  %v1666_v26 = vrot.slane %v3920_v58, %v3034_v60 }
 0x235   : > { %v1691_v56 = vrot.slane %v1683_v47, %v3034_v60  ;;  %v1915_v6 = vrot.slane %v1907_v48, %v3034_v60  ;;  %v1931_v53 = vrot.slane %v1923_v22, %v3034_v60 }
 0x236   : > { %v1841_v50 = vcombine.low %v1802_v33, %v1834_v41  ;;  %v1842_v42 = vcombine.high %v1802_v33, %v1834_v41  ;;  %v1698_v52 = vrot.slane %v1684_v61, %v3034_v60  ;;  %v1922_v33 = vrot.slane %v1908_v45, %v3034_v60 }
 0x237   : > { %2173 = vrot.lane.b32.xlu0 %v1836_v49, %s2658_s19  ;;  %2087 = vrot.lane.b32.xlu1 %v1433_v62, %s2647_s30  ;;  %v1659_v49 = vrot.slane %v3917_v7, %v3034_v60  ;;  %v878_v62 = vsel %vm826_vm1, %v3919_v55, %v768_v63 }
 0x238   : > { %v1875_v13 = vcombine.low %v878_v62, %v886_v37  ;;  %v1705_v32 = vcombine.low %v1666_v26, %v1698_v52  ;;  %v1706_v57 = vcombine.high %v1666_v26, %v1698_v52 }
 0x23a   : > { %v1883_v11 = vrot.slane %v1875_v13, %v3018_v39 }
 0x23b   : > { %2181 = vrot.lane.b32.xlu0 %v1837_v15, %s2659_s20  ;;  %2095 = vrot.lane.b32.xlu1 %v1434_v30, %s2648_s2  ;;  %v1703_v15 = vcombine.low %v1659_v49, %v1691_v56 }
 0x23f   : > { %2189 = vrot.lane.b32.xlu0 %v1838_v40, %s2660_s21  ;;  %2103 = vrot.lane.b32.xlu1 %v1699_v18, %s2649_s3  ;;  %v1704_v40 = vcombine.high %v1659_v49, %v1691_v56  ;;  %v1938_v49 = vrot.slane %v1924_v9, %v3034_v60 }
 0x243   : > { %2197 = vrot.lane.b32.xlu0 %v1839_v12, %s2661_s22  ;;  %2111 = vrot.lane.b32.xlu1 %v1700_v54, %s2650_s4  ;;  %v1876_v54 = vcombine.high %v878_v62, %v886_v37 }
 0x247   : > { %2205 = vrot.lane.b32.xlu0 %v1840_v44, %s2662_s23  ;;  %2119 = vrot.lane.b32.xlu1 %v1701_v34, %s2651_s5  ;;  %v1890_v44 = vrot.slane %v1876_v54, %v3018_v39 }
 0x249   : > { %v1982_v1 = vpop.permute.xlu0 %1981 }
 0x24a   : > { %v2228_v46 = vsel %vm2227_vm2, %v1019_v59, %v1982_v1  ;;  %v882_v59 = vsel %vm826_vm1, %v3918_v8, %v787_v51  ;;  %v3921_v8 = vcombine.low %v3293_v38, %v3296_v10  ;;  %vm3822_vm1 = vcmask 277504  }
 0x24b   : > { %2213 = vrot.lane.b32.xlu0 %v1841_v50, %s2663_s24  ;;  %2127 = vrot.lane.b32.xlu1 %v1702_v0, %s2652_s6  ;;  %v1891_v29 = vcombine.low %v882_v59, %v890_v20  ;;  %v1892_v28 = vcombine.high %v882_v59, %v890_v20 }
 0x24d   : > { %v1990_v5 = vpop.permute.xlu0 %1989  ;;  %v1899_v23 = vrot.slane %v1891_v29, %v3018_v39  ;;  %v1906_v41 = vrot.slane %v1892_v28, %v3018_v39 }
 0x24e   : > { %v2231_v24 = vsel %vm2230_vm3, %v2228_v46, %v1990_v5 }
 0x24f   : > { %2221 = vrot.lane.b32.xlu0 %v1842_v42, %s2664_s25  ;;  %2135 = vrot.lane.b32.xlu1 %v1703_v15, %s2653_s12  ;;  %v1939_v2 = vcombine.low %v1883_v11, %v1899_v23  ;;  %v1940_v14 = vcombine.high %v1883_v11, %v1899_v23  ;;  %v1955_v1 = vcombine.low %v1890_v44, %v1906_v41 }
 0x250   : > { %v1956_v45 = vcombine.high %v1890_v44, %v1906_v41 }
 0x251   : > { %v1998_v30 = vpop.permute.xlu0 %1997  ;;  %v1947_v12 = vrot.slane %v1939_v2, %v3034_v60  ;;  %v1954_v47 = vrot.slane %v1940_v14, %v3034_v60  ;;  %v1963_v46 = vrot.slane %v1955_v1, %v3034_v60 }
 0x252   : > { %v2234_v25 = vsel %vm2233_vm4, %v2231_v24, %v1998_v30  ;;  %v1970_v37 = vrot.slane %v1956_v45, %v3034_v60 }
 0x253   : > { %2143 = vrot.lane.b32.xlu1 %v1704_v40, %s2654_s14  ;;  %v1971_v16 = vcombine.low %v1915_v6, %v1947_v12  ;;  %v1972_v34 = vcombine.high %v1915_v6, %v1947_v12  ;;  %v1973_v56 = vcombine.low %v1922_v33, %v1954_v47  ;;  %v1974_v36 = vcombine.high %v1922_v33, %v1954_v47 }
 0x254   : > { %v1975_v20 = vcombine.low %v1931_v53, %v1963_v46  ;;  %v1976_v7 = vcombine.high %v1931_v53, %v1963_v46  ;;  %v1977_v55 = vcombine.low %v1938_v49, %v1970_v37  ;;  %v1978_v42 = vcombine.high %v1938_v49, %v1970_v37 }
 0x255   : > { %v2006_v18 = vpop.permute.xlu0 %2005 }
 0x256   : > { %v2237_v63 = vsel %vm2236_vm5, %v2234_v25, %v2006_v18 }
 0x257   : > { %2151 = vrot.lane.b32.xlu1 %v1705_v32, %s2655_s15 }
 0x259   : > { %v2014_v43 = vpop.permute.xlu0 %2013 }
 0x25a   : > { %v2240_v17 = vsel %vm2239_vm6, %v2237_v63, %v2014_v43 }
 0x25b   : > { %2159 = vrot.lane.b32.xlu1 %v1706_v57, %s2656_s16 }
 0x25d   : > { %v2022_v51 = vpop.permute.xlu0 %2021 }
 0x25e   : > { %v2243_v21 = vsel %vm2242_vm7, %v2240_v17, %v2022_v51 }
 0x25f   : > { %2167 = vrot.lane.b32.xlu1 %v1971_v16, %s2657_s17 }
 0x261   : > { %v2030_v3 = vpop.permute.xlu0 %2029 }
 0x262   : > { %v2246_v48 = vsel %vm2245_vm8, %v2243_v21, %v2030_v3 }
 0x263   : > { %2175 = vrot.lane.b32.xlu1 %v1972_v34, %s2658_s19 }
 0x265   : > { %v2038_v19 = vpop.permute.xlu0 %2037 }
 0x266   : > { %v2248_v50 = vsel %vm199_vm0, %v2246_v48, %v2038_v19 }
 0x267   : > { %2183 = vrot.lane.b32.xlu1 %v1973_v56, %s2659_s20 }
 0x269   : > { %v2046_v39 = vpop.permute.xlu0 %2045 }
 0x26a   : > { %v2251_v0 = vsel %vm2250_vm9, %v2248_v50, %v2046_v39 }
 0x26b   : > { %2191 = vrot.lane.b32.xlu1 %v1974_v36, %s2660_s21 }
 0x26d   : > { %v2054_v35 = vpop.permute.xlu0 %2053 }
 0x26e   : > { %v2254_v16 = vsel %vm2253_vm10, %v2251_v0, %v2054_v35 }
 0x26f   : > { %2199 = vrot.lane.b32.xlu1 %v1975_v20, %s2661_s22 }
 0x271   : > { %v2062_v27 = vpop.permute.xlu0 %2061 }
 0x272   : > { %v2257_v3 = vsel %vm2256_vm11, %v2254_v16, %v2062_v27 }
 0x273   : > { %2207 = vrot.lane.b32.xlu1 %v1976_v7, %s2662_s23 }
 0x275   : > { %v1984_v61 = vpop.permute.xlu1 %1983  ;;  %v2070_v22 = vpop.permute.xlu0 %2069 }
 0x276   : > { %v2229_v59 = vsel %vm2227_vm2, %v3921_v8, %v1984_v61  ;;  %v2260_v47 = vsel %vm2259_vm12, %v2257_v3, %v2070_v22  ;;  %vm3820_vm2 = vcmask 293888  }
 0x277   : > { %2215 = vrot.lane.b32.xlu1 %v1977_v55, %s2663_s24 }
 0x279   : > { %v2078_v62 = vpop.permute.xlu0 %2077  ;;  %v1992_v5 = vpop.permute.xlu1 %1991 }
 0x27a   : > { %v2232_v29 = vsel %vm2230_vm3, %v2229_v59, %v1992_v5  ;;  %v2263_v48 = vsel %vm2262_vm13, %v2260_v47, %v2078_v62  ;;  %vm3821_vm3 = vcmask 310272  }
 0x27b   : > { %2223 = vrot.lane.b32.xlu1 %v1978_v42, %s2664_s25 }
 0x27d   : > { %v2086_v60 = vpop.permute.xlu0 %2085  ;;  %v2000_v31 = vpop.permute.xlu1 %1999 }
 0x27e   : > { %v2235_v4 = vsel %vm2233_vm4, %v2232_v29, %v2000_v31  ;;  %v2266_v34 = vsel %vm2265_vm14, %v2263_v48, %v2086_v60  ;;  %vm3823_vm4 = vcmask 326656  }
 0x281   : > { %v2094_v9 = vpop.permute.xlu0 %2093  ;;  %v2008_v13 = vpop.permute.xlu1 %2007 }
 0x282   : > { %v2238_v38 = vsel %vm2236_vm5, %v2235_v4, %v2008_v13  ;;  %v2269_v19 = vsel %vm2268_vm15, %v2266_v34, %v2094_v9  ;;  %vm2286_vm5 = vcmask 343040  }
 0x285   : > { %v2102_v10 = vpop.permute.xlu0 %2101  ;;  %v2016_v24 = vpop.permute.xlu1 %2015 }
 0x286   : > { %v2241_v15 = vsel %vm2239_vm6, %v2238_v38, %v2016_v24  ;;  %vm3824_vm6 = vcmask 359424  }
 0x289   : > { %v2110_v52 = vpop.permute.xlu0 %2109  ;;  %v2024_v30 = vpop.permute.xlu1 %2023 }
 0x28a   : > { %v2244_v23 = vsel %vm2242_vm7, %v2241_v15, %v2024_v30  ;;  %vm3825_vm7 = vcmask 375808  }
 0x28d   : > { %v2118_v11 = vpop.permute.xlu0 %2117  ;;  %v2032_v25 = vpop.permute.xlu1 %2031 }
 0x28e   : > { %v2247_v40 = vsel %vm2245_vm8, %v2244_v23, %v2032_v25  ;;  %vm2295_vm8 = vcmask 392192  }
 0x291   : > { %v2126_v58 = vpop.permute.xlu0 %2125  ;;  %v2040_v26 = vpop.permute.xlu1 %2039 }
 0x292   : > { %v2249_v18 = vsel %vm199_vm0, %v2247_v40, %v2040_v26  ;;  %vm2271_vm0 = vcmask 261120  }
 0x293   : > { %v2272_v50 = vsel %vm2271_vm0, %v2269_v19, %v2102_v10 }
 0x294   : > { %v2275_v56 = vsel %vm3822_vm1, %v2272_v50, %v2110_v52  ;;  %vm2307_vm1 = vcmask 457728  }
 0x295   : > { %v2134_v2 = vpop.permute.xlu0 %2133  ;;  %v2048_v63 = vpop.permute.xlu1 %2047  ;;  %v2278_v39 = vsel %vm3820_vm2, %v2275_v56, %v2118_v11  ;;  %vm2301_vm2 = vcmask 424960  }
 0x296   : > { %v3724_v32 = vsel %vm2250_vm9, %v2249_v18, %v2048_v63  ;;  %v2281_v0 = vsel %vm3821_vm3, %v2278_v39, %v2126_v58  ;;  %vm3826_vm9 = vcmask 408576   ;;  %vm2304_vm3 = vcmask 441344  }
 0x297   : > { %v2284_v53 = vsel %vm3823_vm4, %v2281_v0, %v2134_v2  ;;  %vm2310_vm4 = vcmask 474112  }
 0x299   : > { %v2142_v43 = vpop.permute.xlu0 %2141  ;;  %v3726_v12 = vpop.permute.xlu1 %2055 }
 0x29a   : > { %v2287_v35 = vsel %vm2286_vm5, %v2284_v53, %v2142_v43  ;;  %v2255_v10 = vsel %vm2253_vm10, %v3724_v32, %v3726_v12  ;;  %vm3922_vm10 = vcmask 277504  }
 0x29d   : > { %v2150_v17 = vpop.permute.xlu0 %2149  ;;  %v3728_v57 = vpop.permute.xlu1 %2063 }
 0x29e   : > { %v2290_v45 = vsel %vm3824_vm6, %v2287_v35, %v2150_v17  ;;  %vm2313_vm6 = vcmask 490496   ;;  %v2258_v15 = vsel %vm2256_vm11, %v2255_v10, %v3728_v57  ;;  %vm3924_vm11 = vcmask 310272  }
 0x2a1   : > { %v2158_v6 = vpop.permute.xlu0 %2157  ;;  %v3730_v28 = vpop.permute.xlu1 %2071 }
 0x2a2   : > { %v2293_v27 = vsel %vm3825_vm7, %v2290_v45, %v2158_v6  ;;  %vm2316_vm7 = vcmask 506880   ;;  %v2261_v52 = vsel %vm2259_vm12, %v2258_v15, %v3730_v28  ;;  %vm3925_vm12 = vcmask 326656  }
 0x2a5   : > { %v2166_v51 = vpop.permute.xlu0 %2165  ;;  %v3732_v54 = vpop.permute.xlu1 %2079 }
 0x2a6   : > { %v2296_v7 = vsel %vm2295_vm8, %v2293_v27, %v2166_v51  ;;  %v2264_v30 = vsel %vm2262_vm13, %v2261_v52, %v3732_v54  ;;  %vm3926_vm13 = vcmask 359424  }
 0x2a9   : > { %v2174_v14 = vpop.permute.xlu0 %2173  ;;  %v3734_v21 = vpop.permute.xlu1 %2087 }
 0x2aa   : > { %v2299_v49 = vsel %vm3826_vm9, %v2296_v7, %v2174_v14  ;;  %vm3827_vm9 = vcmask 523264   ;;  %v2267_v23 = vsel %vm2265_vm14, %v2264_v30, %v3734_v21  ;;  %vm3927_vm14 = vcmask 375808  }
 0x2ad   : > { %v2182_v41 = vpop.permute.xlu0 %2181  ;;  %v3738_v44 = vpop.permute.xlu1 %2095 }
 0x2ae   : > { %v2302_v61 = vsel %vm2301_vm2, %v2299_v49, %v2182_v41  ;;  %v2270_v25 = vsel %vm2268_vm15, %v2267_v23, %v3738_v44  ;;  %vm3928_vm15 = vcmask 408576  }
 0x2b1   : > { %v2190_v33 = vpop.permute.xlu0 %2189  ;;  %v2104_v1 = vpop.permute.xlu1 %2103 }
 0x2b2   : > { %v2305_v8 = vsel %vm2304_vm3, %v2302_v61, %v2190_v33  ;;  %v2273_v40 = vsel %vm2271_vm0, %v2270_v25, %v2104_v1  ;;  %vm3929_vm0 = vcmask 523264  }
 0x2b5   : > { %v2198_v46 = vpop.permute.xlu0 %2197  ;;  %v2112_v36 = vpop.permute.xlu1 %2111 }
 0x2b6   : > { %v2308_v55 = vsel %vm2307_vm1, %v2305_v8, %v2198_v46  ;;  %v2276_v58 = vsel %vm3922_vm10, %v2273_v40, %v2112_v36 }
 0x2b9   : > { %v2206_v20 = vpop.permute.xlu0 %2205  ;;  %v2120_v37 = vpop.permute.xlu1 %2119 }
 0x2ba   : > { %v2311_v62 = vsel %vm2310_vm4, %v2308_v55, %v2206_v20 }
 0x2bd   : > { %v2214_v22 = vpop.permute.xlu0 %2213  ;;  %v2128_v59 = vpop.permute.xlu1 %2127 }
 0x2be   : > { %v2314_v5 = vsel %vm2313_vm6, %v2311_v62, %v2214_v22 }
 0x2c1   : > { %v2222_v42 = vpop.permute.xlu0 %2221  ;;  %v2136_v29 = vpop.permute.xlu1 %2135 }
 0x2c2   : > { %v2317_v60 = vsel %vm2316_vm7, %v2314_v5, %v2222_v42 }
 0x2c3   : > { %2320 = vst.msk [vmem:[%s3763_s29] sm:$0xff] %vm3827_vm9, %v2317_v60  ;;  %vm3923_vm9 = vcmask 293888  }
 0x2c4   : > { %v2279_v26 = vsel %vm3923_vm9, %v2276_v58, %v2120_v37 }
 0x2c5   : > { %v2144_v31 = vpop.permute.xlu1 %2143  ;;  %v2282_v2 = vsel %vm3924_vm11, %v2279_v26, %v2128_v59 }
 0x2c6   : > { %v2285_v63 = vsel %vm3925_vm12, %v2282_v2, %v2136_v29 }
 0x2c7   : > { %v2288_v32 = vsel %vm2286_vm5, %v2285_v63, %v2144_v31 }
 0x2c9   : > { %v2152_v4 = vpop.permute.xlu1 %2151 }
 0x2ca   : > { %v2291_v43 = vsel %vm3926_vm13, %v2288_v32, %v2152_v4 }
 0x2cd   : > { %v2160_v9 = vpop.permute.xlu1 %2159 }
 0x2ce   : > { %v2294_v17 = vsel %vm3927_vm14, %v2291_v43, %v2160_v9 }
 0x2d1   : > { %v2168_v13 = vpop.permute.xlu1 %2167 }
 0x2d2   : > { %v2297_v57 = vsel %vm2295_vm8, %v2294_v17, %v2168_v13 }
 0x2d5   : > { %v2176_v38 = vpop.permute.xlu1 %2175 }
 0x2d6   : > { %v2300_v6 = vsel %vm3928_vm15, %v2297_v57, %v2176_v38 }
 0x2d9   : > { %v2184_v24 = vpop.permute.xlu1 %2183 }
 0x2da   : > { %v2303_v28 = vsel %vm2301_vm2, %v2300_v6, %v2184_v24 }
 0x2dd   : > { %v2192_v11 = vpop.permute.xlu1 %2191 }
 0x2de   : > { %v2306_v54 = vsel %vm2304_vm3, %v2303_v28, %v2192_v11 }
 0x2e1   : > { %v2200_v18 = vpop.permute.xlu1 %2199 }
 0x2e2   : > { %v2309_v14 = vsel %vm2307_vm1, %v2306_v54, %v2200_v18 }
 0x2e5   : > { %v2208_v12 = vpop.permute.xlu1 %2207 }
 0x2e6   : > { %v2312_v21 = vsel %vm2310_vm4, %v2309_v14, %v2208_v12 }
 0x2e9   : > { %v2216_v51 = vpop.permute.xlu1 %2215 }
 0x2ea   : > { %v2315_v16 = vsel %vm2313_vm6, %v2312_v21, %v2216_v51 }
 0x2ed   : > { %v2224_v41 = vpop.permute.xlu1 %2223 }
 0x2ee   : > { %v2318_v3 = vsel %vm2316_vm7, %v2315_v16, %v2224_v41 }
 0x2ef   : > { %2321 = vst.msk [vmem:[%s3763_s29 + $0x8] sm:$0xff] %vm3929_vm0, %v2318_v3 }
 0x2f0 PF: > { %s14_s11 = sadd.s32 1, %s2627_s11   ;;  %s3930_s6 = smov %s2611_s7 }
 0x2f1   : > { %p11_p8 = scmp.ge.s32.totalorder %s14_s11, 4   ;;  %s3931_s7 = smov %s2615_s8 }
 0x2f2   : > { %s3932_s8 = smov %s2724_s18  ;;  %s3933_s9 = smov %s2623_s10 }
 0x2f3   : > { %s3934_s10 = smov %s3936_s13  ;;  %13 = sbr.rel (!%p11_p8) target bundleno = 4 (0x4), region = 67 }
 0x2f8   :  { %2360 = vsyncpa [#allocation3], 1 }
 0x2f9   :  { %2362 = vsyncpa [#allocation3 + $0x1], 1 }

</bundles_post_ra>
